<compile_context>
chip_gen: v6e
topology: v6e:2x2x1
jax: 0.10.0
libtpu: 0.0.40
codegen_flags: <defaults>
</compile_context>

<pallas_src>
import jax
import jax.numpy as jnp
from jax import lax
from jax.experimental import pallas as pl
from jax.experimental.pallas import tpu as pltpu


# ---------------------------------------------------------------------------
# helpers
# ---------------------------------------------------------------------------
def _round_up(x, m):
    return ((x + m - 1) // m) * m


def _pad_to(x, shape):
    pads = [(0, t - s) for s, t in zip(x.shape, shape)]
    if all(p == (0, 0) for p in pads):
        return x
    return jnp.pad(x, pads)


# ---------------------------------------------------------------------------
# Pass B: single-pass (full-K) tiled matmul with fused bias epilogue.
# ---------------------------------------------------------------------------
def _matmul_bias_kernel(a_ref, b_ref, bias_ref, o_ref):
    o_ref[...] = (jnp.dot(a_ref[...], b_ref[...],
                          preferred_element_type=jnp.float32)
                  + bias_ref[...]).astype(o_ref.dtype)


def matmul_bias(a, b, bias, *, tm=256, tn=512,
                compute_dtype=jnp.bfloat16, out_dtype=jnp.float32):
    """(M, K) @ (K, N) + bias[N] -> (M, N).

    K and N must already be lane-aligned (multiples of 128); only M is padded
    here.  Full K per tile (K = hidden size is small for this model) makes the
    grid purely parallel: every output tile is computed and stored exactly once.
    # TODO(synk): add a k-reduction grid axis if reused with K so large that
    # (tm*K + K*tn) bf16 tiles no longer fit VMEM.
    """
    M, K = a.shape
    K2, N = b.shape
    assert K == K2 and K % 128 == 0 and N % 128 == 0, (a.shape, b.shape)
    assert bias.shape == (N,), bias.shape
    assert tn % 128 == 0 and tm % 8 == 0

    if a.dtype != compute_dtype:
        a = a.astype(compute_dtype)
    if b.dtype != compute_dtype:
        b = b.astype(compute_dtype)

    # Tile sizes: big enough to fill the 256-wide MXU (v6e/v7x), small enough
    # that double-buffered bf16 a/b tiles + f32 out stay a few MiB (fits the
    # 32 MiB scoped VMEM default on v5e/v6e/v7x).
    tm_eff = min(tm, _round_up(M, 8))
    tn_eff = next(c for c in (tn, 256, 128) if N % c == 0)
    Mp = _round_up(M, tm_eff)

    a_p = _pad_to(a, (Mp, K))
    bias_p = bias.astype(jnp.float32).reshape(1, N)

    out = pl.pallas_call(
        _matmul_bias_kernel,
        out_shape=jax.ShapeDtypeStruct((Mp, N), out_dtype),
        grid_spec=pltpu.PrefetchScalarGridSpec(
            num_scalar_prefetch=0,
            grid=(Mp // tm_eff, N // tn_eff),
            in_specs=[
                pl.BlockSpec((tm_eff, K), lambda i, j: (i, 0)),
                pl.BlockSpec((K, tn_eff), lambda i, j: (0, j)),
                pl.BlockSpec((1, tn_eff), lambda i, j: (0, j)),
            ],
            out_specs=pl.BlockSpec((tm_eff, tn_eff), lambda i, j: (i, j)),
        ),
        compiler_params=pltpu.CompilerParams(
            dimension_semantics=("parallel", "parallel"),
        ),
    )(a_p, b, bias_p)
    return out[:M, :N]


# ---------------------------------------------------------------------------
# Pass A: fused (input->gates projection) + sequential LSTM recurrence.
#   x_ref     : (Tc, Bb, Ep)   bf16  features for this (batch block, time chunk)
#   wih_t_ref : (Ep, 4Hp)      bf16  W_ih^T  (constant index -> VMEM resident)
#   whh_t_ref : (Hp, 4Hp)      bf16  W_hh^T  (constant index -> VMEM resident)
#   b_ref     : (1, 4Hp)       f32   b_ih + b_hh (constant index)
#   hid_ref   : (Tc, Bb, Hp)   bf16  hidden states for this chunk
#   h_scr/c_scr persist across grid steps (time axis is sequential per core).
# ---------------------------------------------------------------------------
def _lstm_fused_kernel(x_ref, wih_t_ref, whh_t_ref, b_ref, hid_ref,
                       h_scr, c_scr, xg_scr):
    Tc, Bb, Ep = x_ref.shape
    Hp = h_scr.shape[1]

    # Fresh h/c at the start of each batch block's time loop (zero init state).
    @pl.when(pl.program_id(1) == 0)
    def _():
        h_scr[...] = jnp.zeros_like(h_scr)
        c_scr[...] = jnp.zeros_like(c_scr)

    # ---- batched input->gates projection for this chunk (fused pass) --------
    # One fat (Tc*Bb, Ep) @ (Ep, 4Hp) MXU matmul with the LSTM bias folded in;
    # the result lives only in VMEM scratch (no HBM round trip).  Padded batch
    # rows only ever see the bias; they are sliced off in the wrapper.
    x_flat = x_ref[...].reshape(Tc * Bb, Ep)
    xg_scr[...] = (jnp.dot(x_flat, wih_t_ref[...],
                           preferred_element_type=jnp.float32)
                   + b_ref[...])

    # ---- sequential recurrence: only h_prev @ W_hh^T on the serial path -----
    # TODO(synk): at tiny Bb the MXU is latency-bound on re-pushing W_hh^T each
    # step; pltpu.matmul_push_rhs/matmul_acc_lhs could keep it staged per chunk.
    def step(t, carry):
        h_prev, c_prev = carry
        gates = xg_scr[pl.ds(t * Bb, Bb), :] + jnp.dot(
            h_prev.astype(whh_t_ref.dtype), whh_t_ref[...],
            preferred_element_type=jnp.float32)
        # PyTorch gate order [i, f, g, o]; Hp is a multiple of 128 so each slice
        # is a lane-aligned set of full vregs (no lane relayout).
        i_g = jax.nn.sigmoid(gates[:, 0 * Hp:1 * Hp])
        f_g = jax.nn.sigmoid(gates[:, 1 * Hp:2 * Hp])
        g_g = jnp.tanh(gates[:, 2 * Hp:3 * Hp])
        o_g = jax.nn.sigmoid(gates[:, 3 * Hp:4 * Hp])
        c_new = f_g * c_prev + i_g * g_g
        h_new = o_g * jnp.tanh(c_new)
        hid_ref[t] = h_new.astype(hid_ref.dtype)   # bf16 store (lane-dense)
        return h_new, c_new

    # Full unroll keeps the LLO scheduler in view; fine while Bb*4Hp live gate
    # values are a handful of vregs.  Lower time_chunk for very large Bb*Hp.
    h_fin, c_fin = lax.fori_loop(0, Tc, step, (h_scr[...], c_scr[...]),
                                 unroll=True)
    h_scr[...] = h_fin
    c_scr[...] = c_fin


# ---------------------------------------------------------------------------
# One-time parameter prep (hoisted out of the forward pass).
# ---------------------------------------------------------------------------
def prepare_decoder_params(params, *, compute_dtype=jnp.bfloat16):
    """Pad weights to (8,128) granules, transpose, cast to bf16 -- once.

    Padded hidden/embed/vocab columns carry zero weights, so the unpadded
    output slice is mathematically exact.
    """
    H = params["w_hh"].shape[1]
    E = params["w_ih"].shape[1]
    V = params["w_lin"].shape[0]
    Ep, Hp, Vp = _round_up(E, 128), _round_up(H, 128), _round_up(V, 128)

    def pad_gate_mat(w, in_dim, in_dim_p):          # (4H, in) -> (4Hp, in_p)
        w4 = w.reshape(4, H, in_dim)                # pad *within* each gate block
        w4 = _pad_to(w4, (4, Hp, in_dim_p))
        return w4.reshape(4 * Hp, in_dim_p)

    b = _pad_to((params["b_ih"] + params["b_hh"]).reshape(4, H), (4, Hp))
    return {
        "wih_t": pad_gate_mat(params["w_ih"], E, Ep).T.astype(compute_dtype),  # (Ep, 4Hp)
        "whh_t": pad_gate_mat(params["w_hh"], H, Hp).T.astype(compute_dtype),  # (Hp, 4Hp)
        "b": b.reshape(1, 4 * Hp).astype(jnp.float32),                         # (1, 4Hp)
        "wlin_t": _pad_to(params["w_lin"], (Vp, Hp)).T.astype(compute_dtype),  # (Hp, Vp)
        "b_lin": _pad_to(params["b_lin"], (Vp,)).astype(jnp.float32),          # (Vp,)
        "dims": (E, H, V),
        "padded": (Ep, Hp, Vp),
        "compute_dtype": compute_dtype,
    }


# ---------------------------------------------------------------------------
# Forward pass
# ---------------------------------------------------------------------------
def decoder_rnn_forward(features, captions, prepped, *,
                        time_chunk=8, batch_block=None):
    """features: (T, B, E) f32; captions: (T, B) int32 (dead path, unused).

    Returns (T, B, V) f32, matching DecoderRNN.forward.
    """
    del captions  # embed(captions)+dropout is computed then discarded in the reference
    T, B, E = features.shape
    E0, H, V = prepped["dims"]
    Ep, Hp, Vp = prepped["padded"]
    assert E == E0, (E, E0)
    cdt = prepped["compute_dtype"]

    # 16-row batch granule: sublane-tile safe for both f32 state and the bf16
    # activations/outputs.  Padded rows only ever see the bias (wasted compute,
    # but exact: they are sliced off and never reduced over inside the kernel).
    Bp = _round_up(B, 16)
    Tc = min(time_chunk, T)
    Tp = _round_up(T, Tc)
    # batch_block < Bp lets v7x's two TensorCores each take independent batch
    # blocks (leading "parallel" grid axis); leave None on single-TC chips.
    Bb = Bp if batch_block is None else min(_round_up(batch_block, 16), Bp)
    assert Bp % Bb == 0

    feats_p = _pad_to(features, (Tp, Bp, Ep)).astype(cdt)

    # ---- pass A: fused input projection + sequential recurrence -------------
    # VMEM per grid step ~ 2*Tc*Bb*Ep (bf16 in) + Ep*4Hp + Hp*4Hp (bf16 weights,
    # resident) + Tc*Bb*4Hp f32 (gates scratch) + 2*Tc*Bb*Hp (bf16 out).
    # Lower time_chunk / batch_block if this approaches the 32 MiB scoped
    # default (v7x physical VMEM is 64 MiB).
    hiddens = pl.pallas_call(
        _lstm_fused_kernel,
        out_shape=jax.ShapeDtypeStruct((Tp, Bp, Hp), cdt),
        grid_spec=pltpu.PrefetchScalarGridSpec(
            num_scalar_prefetch=0,
            grid=(Bp // Bb, Tp // Tc),
            in_specs=[
                pl.BlockSpec((Tc, Bb, Ep), lambda b, t: (t, b, 0)),
                pl.BlockSpec((Ep, 4 * Hp), lambda b, t: (0, 0)),   # W_ih^T resident
                pl.BlockSpec((Hp, 4 * Hp), lambda b, t: (0, 0)),   # W_hh^T resident
                pl.BlockSpec((1, 4 * Hp), lambda b, t: (0, 0)),    # bias resident
            ],
            out_specs=pl.BlockSpec((Tc, Bb, Hp), lambda b, t: (t, b, 0)),
            scratch_shapes=[
                pltpu.VMEM((Bb, Hp), jnp.float32),            # h state
                pltpu.VMEM((Bb, Hp), jnp.float32),            # c state
                pltpu.VMEM((Tc * Bb, 4 * Hp), jnp.float32),   # chunk gates xg
            ],
        ),
        compiler_params=pltpu.CompilerParams(
            # batch blocks independent (megacore-splittable on v7x);
            # time axis is a true recurrence.
            dimension_semantics=("parallel", "arbitrary"),
        ),
    )(feats_p, prepped["wih_t"], prepped["whh_t"], prepped["b"])

    # ---- pass B: output projection (bulk of FLOPs), bf16 A, full-K tiles ----
    out = matmul_bias(hiddens.reshape(Tp * Bp, Hp), prepped["wlin_t"],
                      prepped["b_lin"], compute_dtype=cdt)
    return out.reshape(Tp, Bp, Vp)[:T, :B, :V]


# ---------------------------------------------------------------------------
# Pure-JAX f32 reference (lax.scan LSTM) mirroring PyTorch nn.LSTM + Linear.
# ---------------------------------------------------------------------------
def decoder_rnn_reference(features, params):
    T, B, E = features.shape
    H = params["w_hh"].shape[1]

    w_ih, w_hh = params["w_ih"], params["w_hh"]
    b = params["b_ih"] + params["b_hh"]

    def step(carry, x_t):
        h, c = carry
        gates = x_t @ w_ih.T + h @ w_hh.T + b
        i = jax.nn.sigmoid(gates[:, 0 * H:1 * H])
        f = jax.nn.sigmoid(gates[:, 1 * H:2 * H])
        g = jnp.tanh(gates[:, 2 * H:3 * H])
        o = jax.nn.sigmoid(gates[:, 3 * H:4 * H])
        c_new = f * c + i * g
        h_new = o * jnp.tanh(c_new)
        return (h_new, c_new), h_new

    h0 = jnp.zeros((B, H), jnp.float32)
    c0 = jnp.zeros((B, H), jnp.float32)
    _, hiddens = lax.scan(step, (h0, c0), features)        # (T, B, H)
    return hiddens @ params["w_lin"].T + params["b_lin"]   # (T, B, V)


def init_params(key, embed_size, hidden_size, vocab_size):
    ks = jax.random.split(key, 6)
    s = 1.0 / jnp.sqrt(hidden_size)
    return {
        # nn.LSTM parameters (single layer), PyTorch gate order [i, f, g, o]
        "w_ih": jax.random.uniform(ks[0], (4 * hidden_size, embed_size), jnp.float32, -s, s),
        "w_hh": jax.random.uniform(ks[1], (4 * hidden_size, hidden_size), jnp.float32, -s, s),
        "b_ih": jax.random.uniform(ks[2], (4 * hidden_size,), jnp.float32, -s, s),
        "b_hh": jax.random.uniform(ks[3], (4 * hidden_size,), jnp.float32, -s, s),
        # nn.Linear(hidden_size, vocab_size)
        "w_lin": jax.random.uniform(ks[4], (vocab_size, hidden_size), jnp.float32, -s, s),
        "b_lin": jax.random.uniform(ks[5], (vocab_size,), jnp.float32, -s, s),
        # TODO(synk): nn.Embedding(vocab_size, embed_size) + Dropout(0.5) are dead
        # code in forward() (result overwritten by `features`), so not materialized.
    }


if __name__ == "__main__":
    T, B = 8, 2                 # seq_len, batch
    E, H, V = 32, 32, 64        # embed_size, hidden_size, vocab_size

    key = jax.random.PRNGKey(0)
    k_feat, k_cap, k_param = jax.random.split(key, 3)

    features = jax.random.normal(k_feat, (T, B, E), jnp.float32)
    captions = jax.random.randint(k_cap, (T, B), 0, V, jnp.int32)
    params = init_params(k_param, E, H, V)

    prepped = prepare_decoder_params(params)   # one-time weight pad/transpose/cast
    out = decoder_rnn_forward(features, captions, prepped)
    out = jax.block_until_ready(out)

    ref = decoder_rnn_reference(features, params)
    assert out.shape == (T, B, V), out.shape
    # bf16 MXU matmuls / bf16 hiddens (f32 accumulation, f32 h/c state)
    # -> relaxed tolerance vs f32 reference.
    assert jnp.allclose(out, ref, atol=5e-2, rtol=5e-2), float(jnp.max(jnp.abs(out - ref)))

    print("KERNEL_OK")
</pallas_src>

<mosaic_0001>
module attributes {stable_mosaic.version = 11 : i64} {
  func.func @_lstm_fused_kernel(%arg0: i32, %arg1: i32, %arg2: memref<8x16x128xbf16, #tpu.memory_space<vmem>>, %arg3: memref<128x512xbf16, #tpu.memory_space<vmem>>, %arg4: memref<128x512xbf16, #tpu.memory_space<vmem>>, %arg5: memref<1x512xf32, #tpu.memory_space<vmem>>, %arg6: memref<8x16x128xbf16, #tpu.memory_space<vmem>>, %arg7: memref<16x128xf32, #tpu.memory_space<vmem>>, %arg8: memref<16x128xf32, #tpu.memory_space<vmem>>, %arg9: memref<128x512xf32, #tpu.memory_space<vmem>>) attributes {dimension_semantics = [#tpu.dimension_semantics<parallel>, #tpu.dimension_semantics<arbitrary>], iteration_bounds = array<i64: 1, 1>, scalar_prefetch = 0 : i64, scratch_operands = 3 : i64, tpu.core_type = #tpu.core_type<tc>, window_params = [{transform_indices = @transform_0, window_bounds = array<i64: 8, 16, 128>}, {pipeline_mode = #tpu.pipeline_mode<synchronous>, transform_indices = @transform_1, window_bounds = array<i64: 128, 512>}, {pipeline_mode = #tpu.pipeline_mode<synchronous>, transform_indices = @transform_2, window_bounds = array<i64: 128, 512>}, {pipeline_mode = #tpu.pipeline_mode<synchronous>, transform_indices = @transform_3, window_bounds = array<i64: 1, 512>}, {transform_indices = @transform_4, window_bounds = array<i64: 8, 16, 128>}]} {
    %c0_i32 = arith.constant 0 : i32
    %0 = arith.cmpi eq, %arg1, %c0_i32 : i32
    %1 = arith.extui %0 : i1 to i32
    %c0_i32_0 = arith.constant 0 : i32
    %2 = arith.cmpi ne, %1, %c0_i32_0 : i32
    scf.if %2 {
      %cst_97 = arith.constant 0.000000e+00 : f32
      %311 = vector.broadcast %cst_97 : f32 to vector<16x128xf32>
      %c0_98 = arith.constant 0 : index
      %c0_99 = arith.constant 0 : index
      %312 = vector.load %arg7[%c0_98, %c0_99] : memref<16x128xf32, #tpu.memory_space<vmem>>, vector<16x128xf32>
      tpu.vector_store %arg7[%c0_98, %c0_99], %311 {strides = array<i32>} : memref<16x128xf32, #tpu.memory_space<vmem>>, vector<16x128xf32>,
      %cst_100 = arith.constant 0.000000e+00 : f32
      %313 = vector.broadcast %cst_100 : f32 to vector<16x128xf32>
      %c0_101 = arith.constant 0 : index
      %c0_102 = arith.constant 0 : index
      %314 = vector.load %arg8[%c0_101, %c0_102] : memref<16x128xf32, #tpu.memory_space<vmem>>, vector<16x128xf32>
      tpu.vector_store %arg8[%c0_101, %c0_102], %313 {strides = array<i32>} : memref<16x128xf32, #tpu.memory_space<vmem>>, vector<16x128xf32>,
    } else {
    }
    %c0 = arith.constant 0 : index
    %c0_1 = arith.constant 0 : index
    %c0_2 = arith.constant 0 : index
    %3 = vector.load %arg2[%c0, %c0_1, %c0_2] : memref<8x16x128xbf16, #tpu.memory_space<vmem>>, vector<8x16x128xbf16>
    %4 = vector.shape_cast %3 : vector<8x16x128xbf16> to vector<128x128xbf16>
    %c0_3 = arith.constant 0 : index
    %c0_4 = arith.constant 0 : index
    %5 = vector.load %arg3[%c0_3, %c0_4] : memref<128x512xbf16, #tpu.memory_space<vmem>>, vector<128x512xbf16>
    %cst = arith.constant dense<0.000000e+00> : vector<128x512xf32>
    %6 = tpu.matmul %4, %5, %cst {dimension_numbers = #tpu.dot_dimension_numbers<[1], [0], [0], [1], [0, 0, 1, 1], [], []>} : vector<128x128xbf16>, vector<128x512xbf16>, vector<128x512xf32> -> vector<128x512xf32>
    %c0_5 = arith.constant 0 : index
    %c0_6 = arith.constant 0 : index
    %7 = vector.load %arg5[%c0_5, %c0_6] : memref<1x512xf32, #tpu.memory_space<vmem>>, vector<1x512xf32>
    %8 = vector.broadcast %7 : vector<1x512xf32> to vector<128x512xf32>
    %9 = arith.addf %6, %8 : vector<128x512xf32>
    %c0_7 = arith.constant 0 : index
    %c0_8 = arith.constant 0 : index
    %10 = vector.load %arg9[%c0_7, %c0_8] : memref<128x512xf32, #tpu.memory_space<vmem>>, vector<128x512xf32>
    tpu.vector_store %arg9[%c0_7, %c0_8], %9 {strides = array<i32>} : memref<128x512xf32, #tpu.memory_space<vmem>>, vector<128x512xf32>,
    %c0_9 = arith.constant 0 : index
    %c0_10 = arith.constant 0 : index
    %11 = vector.load %arg7[%c0_9, %c0_10] : memref<16x128xf32, #tpu.memory_space<vmem>>, vector<16x128xf32>
    %c0_11 = arith.constant 0 : index
    %c0_12 = arith.constant 0 : index
    %12 = vector.load %arg8[%c0_11, %c0_12] : memref<16x128xf32, #tpu.memory_space<vmem>>, vector<16x128xf32>
    %c0_i32_13 = arith.constant 0 : i32
    %c16_i32 = arith.constant 16 : i32
    %13 = arith.muli %c0_i32_13, %c16_i32 : i32
    %14 = arith.index_cast %13 : i32 to index
    %c0_14 = arith.constant 0 : index
    %15 = vector.load %arg9[%14, %c0_14] : memref<128x512xf32, #tpu.memory_space<vmem>>, vector<16x512xf32>
    %16 = arith.truncf %11 : vector<16x128xf32> to vector<16x128xbf16>
    %c0_15 = arith.constant 0 : index
    %c0_16 = arith.constant 0 : index
    %17 = vector.load %arg4[%c0_15, %c0_16] : memref<128x512xbf16, #tpu.memory_space<vmem>>, vector<128x512xbf16>
    %cst_17 = arith.constant dense<0.000000e+00> : vector<16x512xf32>
    %18 = tpu.matmul %16, %17, %cst_17 {dimension_numbers = #tpu.dot_dimension_numbers<[1], [0], [0], [1], [0, 0, 1, 1], [], []>} : vector<16x128xbf16>, vector<128x512xbf16>, vector<16x512xf32> -> vector<16x512xf32>
    %19 = arith.addf %15, %18 : vector<16x512xf32>
    %20 = vector.extract_strided_slice %19 {offsets = [0, 0], sizes = [16, 128], strides = [1, 1]} : vector<16x512xf32> to vector<16x128xf32>
    %21 = arith.negf %20 : vector<16x128xf32>
    %22 = math.exp %21 : vector<16x128xf32>
    %cst_18 = arith.constant 1.000000e+00 : f32
    %23 = vector.broadcast %cst_18 : f32 to vector<16x128xf32>
    %24 = arith.addf %23, %22 : vector<16x128xf32>
    %25 = arith.divf %23, %24 : vector<16x128xf32>
    %26 = vector.extract_strided_slice %19 {offsets = [0, 128], sizes = [16, 128], strides = [1, 1]} : vector<16x512xf32> to vector<16x128xf32>
    %27 = arith.negf %26 : vector<16x128xf32>
    %28 = math.exp %27 : vector<16x128xf32>
    %cst_19 = arith.constant 1.000000e+00 : f32
    %29 = vector.broadcast %cst_19 : f32 to vector<16x128xf32>
    %30 = arith.addf %29, %28 : vector<16x128xf32>
    %31 = arith.divf %29, %30 : vector<16x128xf32>
    %32 = vector.extract_strided_slice %19 {offsets = [0, 256], sizes = [16, 128], strides = [1, 1]} : vector<16x512xf32> to vector<16x128xf32>
    %33 = math.tanh %32 : vector<16x128xf32>
    %34 = vector.extract_strided_slice %19 {offsets = [0, 384], sizes = [16, 128], strides = [1, 1]} : vector<16x512xf32> to vector<16x128xf32>
    %35 = arith.negf %34 : vector<16x128xf32>
    %36 = math.exp %35 : vector<16x128xf32>
    %cst_20 = arith.constant 1.000000e+00 : f32
    %37 = vector.broadcast %cst_20 : f32 to vector<16x128xf32>
    %38 = arith.addf %37, %36 : vector<16x128xf32>
    %39 = arith.divf %37, %38 : vector<16x128xf32>
    %40 = arith.mulf %31, %12 : vector<16x128xf32>
    %41 = arith.mulf %25, %33 : vector<16x128xf32>
    %42 = arith.addf %40, %41 : vector<16x128xf32>
    %43 = math.tanh %42 : vector<16x128xf32>
    %44 = arith.mulf %39, %43 : vector<16x128xf32>
    %45 = arith.truncf %44 : vector<16x128xf32> to vector<16x128xbf16>
    %46 = arith.index_cast %c0_i32_13 : i32 to index
    %c0_21 = arith.constant 0 : index
    %c0_22 = arith.constant 0 : index
    %47 = vector.load %arg6[%46, %c0_21, %c0_22] : memref<8x16x128xbf16, #tpu.memory_space<vmem>>, vector<1x16x128xbf16>
    %48 = vector.shape_cast %47 : vector<1x16x128xbf16> to vector<16x128xbf16>
    %49 = vector.shape_cast %45 : vector<16x128xbf16> to vector<1x16x128xbf16>
    tpu.vector_store %arg6[%46, %c0_21, %c0_22], %49 {strides = array<i32>} : memref<8x16x128xbf16, #tpu.memory_space<vmem>>, vector<1x16x128xbf16>,
    %c1_i32 = arith.constant 1 : i32
    %c16_i32_23 = arith.constant 16 : i32
    %50 = arith.muli %c1_i32, %c16_i32_23 : i32
    %51 = arith.index_cast %50 : i32 to index
    %c0_24 = arith.constant 0 : index
    %52 = vector.load %arg9[%51, %c0_24] : memref<128x512xf32, #tpu.memory_space<vmem>>, vector<16x512xf32>
    %53 = arith.truncf %44 : vector<16x128xf32> to vector<16x128xbf16>
    %c0_25 = arith.constant 0 : index
    %c0_26 = arith.constant 0 : index
    %54 = vector.load %arg4[%c0_25, %c0_26] : memref<128x512xbf16, #tpu.memory_space<vmem>>, vector<128x512xbf16>
    %cst_27 = arith.constant dense<0.000000e+00> : vector<16x512xf32>
    %55 = tpu.matmul %53, %54, %cst_27 {dimension_numbers = #tpu.dot_dimension_numbers<[1], [0], [0], [1], [0, 0, 1, 1], [], []>} : vector<16x128xbf16>, vector<128x512xbf16>, vector<16x512xf32> -> vector<16x512xf32>
    %56 = arith.addf %52, %55 : vector<16x512xf32>
    %57 = vector.extract_strided_slice %56 {offsets = [0, 0], sizes = [16, 128], strides = [1, 1]} : vector<16x512xf32> to vector<16x128xf32>
    %58 = arith.negf %57 : vector<16x128xf32>
    %59 = math.exp %58 : vector<16x128xf32>
    %cst_28 = arith.constant 1.000000e+00 : f32
    %60 = vector.broadcast %cst_28 : f32 to vector<16x128xf32>
    %61 = arith.addf %60, %59 : vector<16x128xf32>
    %62 = arith.divf %60, %61 : vector<16x128xf32>
    %63 = vector.extract_strided_slice %56 {offsets = [0, 128], sizes = [16, 128], strides = [1, 1]} : vector<16x512xf32> to vector<16x128xf32>
    %64 = arith.negf %63 : vector<16x128xf32>
    %65 = math.exp %64 : vector<16x128xf32>
    %cst_29 = arith.constant 1.000000e+00 : f32
    %66 = vector.broadcast %cst_29 : f32 to vector<16x128xf32>
    %67 = arith.addf %66, %65 : vector<16x128xf32>
    %68 = arith.divf %66, %67 : vector<16x128xf32>
    %69 = vector.extract_strided_slice %56 {offsets = [0, 256], sizes = [16, 128], strides = [1, 1]} : vector<16x512xf32> to vector<16x128xf32>
    %70 = math.tanh %69 : vector<16x128xf32>
    %71 = vector.extract_strided_slice %56 {offsets = [0, 384], sizes = [16, 128], strides = [1, 1]} : vector<16x512xf32> to vector<16x128xf32>
    %72 = arith.negf %71 : vector<16x128xf32>
    %73 = math.exp %72 : vector<16x128xf32>
    %cst_30 = arith.constant 1.000000e+00 : f32
    %74 = vector.broadcast %cst_30 : f32 to vector<16x128xf32>
    %75 = arith.addf %74, %73 : vector<16x128xf32>
    %76 = arith.divf %74, %75 : vector<16x128xf32>
    %77 = arith.mulf %68, %42 : vector<16x128xf32>
    %78 = arith.mulf %62, %70 : vector<16x128xf32>
    %79 = arith.addf %77, %78 : vector<16x128xf32>
    %80 = math.tanh %79 : vector<16x128xf32>
    %81 = arith.mulf %76, %80 : vector<16x128xf32>
    %82 = arith.truncf %81 : vector<16x128xf32> to vector<16x128xbf16>
    %83 = arith.index_cast %c1_i32 : i32 to index
    %c0_31 = arith.constant 0 : index
    %c0_32 = arith.constant 0 : index
    %84 = vector.load %arg6[%83, %c0_31, %c0_32] : memref<8x16x128xbf16, #tpu.memory_space<vmem>>, vector<1x16x128xbf16>
    %85 = vector.shape_cast %84 : vector<1x16x128xbf16> to vector<16x128xbf16>
    %86 = vector.shape_cast %82 : vector<16x128xbf16> to vector<1x16x128xbf16>
    tpu.vector_store %arg6[%83, %c0_31, %c0_32], %86 {strides = array<i32>} : memref<8x16x128xbf16, #tpu.memory_space<vmem>>, vector<1x16x128xbf16>,
    %c2_i32 = arith.constant 2 : i32
    %c16_i32_33 = arith.constant 16 : i32
    %87 = arith.muli %c2_i32, %c16_i32_33 : i32
    %88 = arith.index_cast %87 : i32 to index
    %c0_34 = arith.constant 0 : index
    %89 = vector.load %arg9[%88, %c0_34] : memref<128x512xf32, #tpu.memory_space<vmem>>, vector<16x512xf32>
    %90 = arith.truncf %81 : vector<16x128xf32> to vector<16x128xbf16>
    %c0_35 = arith.constant 0 : index
    %c0_36 = arith.constant 0 : index
    %91 = vector.load %arg4[%c0_35, %c0_36] : memref<128x512xbf16, #tpu.memory_space<vmem>>, vector<128x512xbf16>
    %cst_37 = arith.constant dense<0.000000e+00> : vector<16x512xf32>
    %92 = tpu.matmul %90, %91, %cst_37 {dimension_numbers = #tpu.dot_dimension_numbers<[1], [0], [0], [1], [0, 0, 1, 1], [], []>} : vector<16x128xbf16>, vector<128x512xbf16>, vector<16x512xf32> -> vector<16x512xf32>
    %93 = arith.addf %89, %92 : vector<16x512xf32>
    %94 = vector.extract_strided_slice %93 {offsets = [0, 0], sizes = [16, 128], strides = [1, 1]} : vector<16x512xf32> to vector<16x128xf32>
    %95 = arith.negf %94 : vector<16x128xf32>
    %96 = math.exp %95 : vector<16x128xf32>
    %cst_38 = arith.constant 1.000000e+00 : f32
    %97 = vector.broadcast %cst_38 : f32 to vector<16x128xf32>
    %98 = arith.addf %97, %96 : vector<16x128xf32>
    %99 = arith.divf %97, %98 : vector<16x128xf32>
    %100 = vector.extract_strided_slice %93 {offsets = [0, 128], sizes = [16, 128], strides = [1, 1]} : vector<16x512xf32> to vector<16x128xf32>
    %101 = arith.negf %100 : vector<16x128xf32>
    %102 = math.exp %101 : vector<16x128xf32>
    %cst_39 = arith.constant 1.000000e+00 : f32
    %103 = vector.broadcast %cst_39 : f32 to vector<16x128xf32>
    %104 = arith.addf %103, %102 : vector<16x128xf32>
    %105 = arith.divf %103, %104 : vector<16x128xf32>
    %106 = vector.extract_strided_slice %93 {offsets = [0, 256], sizes = [16, 128], strides = [1, 1]} : vector<16x512xf32> to vector<16x128xf32>
    %107 = math.tanh %106 : vector<16x128xf32>
    %108 = vector.extract_strided_slice %93 {offsets = [0, 384], sizes = [16, 128], strides = [1, 1]} : vector<16x512xf32> to vector<16x128xf32>
    %109 = arith.negf %108 : vector<16x128xf32>
    %110 = math.exp %109 : vector<16x128xf32>
    %cst_40 = arith.constant 1.000000e+00 : f32
    %111 = vector.broadcast %cst_40 : f32 to vector<16x128xf32>
    %112 = arith.addf %111, %110 : vector<16x128xf32>
    %113 = arith.divf %111, %112 : vector<16x128xf32>
    %114 = arith.mulf %105, %79 : vector<16x128xf32>
    %115 = arith.mulf %99, %107 : vector<16x128xf32>
    %116 = arith.addf %114, %115 : vector<16x128xf32>
    %117 = math.tanh %116 : vector<16x128xf32>
    %118 = arith.mulf %113, %117 : vector<16x128xf32>
    %119 = arith.truncf %118 : vector<16x128xf32> to vector<16x128xbf16>
    %120 = arith.index_cast %c2_i32 : i32 to index
    %c0_41 = arith.constant 0 : index
    %c0_42 = arith.constant 0 : index
    %121 = vector.load %arg6[%120, %c0_41, %c0_42] : memref<8x16x128xbf16, #tpu.memory_space<vmem>>, vector<1x16x128xbf16>
    %122 = vector.shape_cast %121 : vector<1x16x128xbf16> to vector<16x128xbf16>
    %123 = vector.shape_cast %119 : vector<16x128xbf16> to vector<1x16x128xbf16>
    tpu.vector_store %arg6[%120, %c0_41, %c0_42], %123 {strides = array<i32>} : memref<8x16x128xbf16, #tpu.memory_space<vmem>>, vector<1x16x128xbf16>,
    %c3_i32 = arith.constant 3 : i32
    %c16_i32_43 = arith.constant 16 : i32
    %124 = arith.muli %c3_i32, %c16_i32_43 : i32
    %125 = arith.index_cast %124 : i32 to index
    %c0_44 = arith.constant 0 : index
    %126 = vector.load %arg9[%125, %c0_44] : memref<128x512xf32, #tpu.memory_space<vmem>>, vector<16x512xf32>
    %127 = arith.truncf %118 : vector<16x128xf32> to vector<16x128xbf16>
    %c0_45 = arith.constant 0 : index
    %c0_46 = arith.constant 0 : index
    %128 = vector.load %arg4[%c0_45, %c0_46] : memref<128x512xbf16, #tpu.memory_space<vmem>>, vector<128x512xbf16>
    %cst_47 = arith.constant dense<0.000000e+00> : vector<16x512xf32>
    %129 = tpu.matmul %127, %128, %cst_47 {dimension_numbers = #tpu.dot_dimension_numbers<[1], [0], [0], [1], [0, 0, 1, 1], [], []>} : vector<16x128xbf16>, vector<128x512xbf16>, vector<16x512xf32> -> vector<16x512xf32>
    %130 = arith.addf %126, %129 : vector<16x512xf32>
    %131 = vector.extract_strided_slice %130 {offsets = [0, 0], sizes = [16, 128], strides = [1, 1]} : vector<16x512xf32> to vector<16x128xf32>
    %132 = arith.negf %131 : vector<16x128xf32>
    %133 = math.exp %132 : vector<16x128xf32>
    %cst_48 = arith.constant 1.000000e+00 : f32
    %134 = vector.broadcast %cst_48 : f32 to vector<16x128xf32>
    %135 = arith.addf %134, %133 : vector<16x128xf32>
    %136 = arith.divf %134, %135 : vector<16x128xf32>
    %137 = vector.extract_strided_slice %130 {offsets = [0, 128], sizes = [16, 128], strides = [1, 1]} : vector<16x512xf32> to vector<16x128xf32>
    %138 = arith.negf %137 : vector<16x128xf32>
    %139 = math.exp %138 : vector<16x128xf32>
    %cst_49 = arith.constant 1.000000e+00 : f32
    %140 = vector.broadcast %cst_49 : f32 to vector<16x128xf32>
    %141 = arith.addf %140, %139 : vector<16x128xf32>
    %142 = arith.divf %140, %141 : vector<16x128xf32>
    %143 = vector.extract_strided_slice %130 {offsets = [0, 256], sizes = [16, 128], strides = [1, 1]} : vector<16x512xf32> to vector<16x128xf32>
    %144 = math.tanh %143 : vector<16x128xf32>
    %145 = vector.extract_strided_slice %130 {offsets = [0, 384], sizes = [16, 128], strides = [1, 1]} : vector<16x512xf32> to vector<16x128xf32>
    %146 = arith.negf %145 : vector<16x128xf32>
    %147 = math.exp %146 : vector<16x128xf32>
    %cst_50 = arith.constant 1.000000e+00 : f32
    %148 = vector.broadcast %cst_50 : f32 to vector<16x128xf32>
    %149 = arith.addf %148, %147 : vector<16x128xf32>
    %150 = arith.divf %148, %149 : vector<16x128xf32>
    %151 = arith.mulf %142, %116 : vector<16x128xf32>
    %152 = arith.mulf %136, %144 : vector<16x128xf32>
    %153 = arith.addf %151, %152 : vector<16x128xf32>
    %154 = math.tanh %153 : vector<16x128xf32>
    %155 = arith.mulf %150, %154 : vector<16x128xf32>
    %156 = arith.truncf %155 : vector<16x128xf32> to vector<16x128xbf16>
    %157 = arith.index_cast %c3_i32 : i32 to index
    %c0_51 = arith.constant 0 : index
    %c0_52 = arith.constant 0 : index
    %158 = vector.load %arg6[%157, %c0_51, %c0_52] : memref<8x16x128xbf16, #tpu.memory_space<vmem>>, vector<1x16x128xbf16>
    %159 = vector.shape_cast %158 : vector<1x16x128xbf16> to vector<16x128xbf16>
    %160 = vector.shape_cast %156 : vector<16x128xbf16> to vector<1x16x128xbf16>
    tpu.vector_store %arg6[%157, %c0_51, %c0_52], %160 {strides = array<i32>} : memref<8x16x128xbf16, #tpu.memory_space<vmem>>, vector<1x16x128xbf16>,
    %c4_i32 = arith.constant 4 : i32
    %c16_i32_53 = arith.constant 16 : i32
    %161 = arith.muli %c4_i32, %c16_i32_53 : i32
    %162 = arith.index_cast %161 : i32 to index
    %c0_54 = arith.constant 0 : index
    %163 = vector.load %arg9[%162, %c0_54] : memref<128x512xf32, #tpu.memory_space<vmem>>, vector<16x512xf32>
    %164 = arith.truncf %155 : vector<16x128xf32> to vector<16x128xbf16>
    %c0_55 = arith.constant 0 : index
    %c0_56 = arith.constant 0 : index
    %165 = vector.load %arg4[%c0_55, %c0_56] : memref<128x512xbf16, #tpu.memory_space<vmem>>, vector<128x512xbf16>
    %cst_57 = arith.constant dense<0.000000e+00> : vector<16x512xf32>
    %166 = tpu.matmul %164, %165, %cst_57 {dimension_numbers = #tpu.dot_dimension_numbers<[1], [0], [0], [1], [0, 0, 1, 1], [], []>} : vector<16x128xbf16>, vector<128x512xbf16>, vector<16x512xf32> -> vector<16x512xf32>
    %167 = arith.addf %163, %166 : vector<16x512xf32>
    %168 = vector.extract_strided_slice %167 {offsets = [0, 0], sizes = [16, 128], strides = [1, 1]} : vector<16x512xf32> to vector<16x128xf32>
    %169 = arith.negf %168 : vector<16x128xf32>
    %170 = math.exp %169 : vector<16x128xf32>
    %cst_58 = arith.constant 1.000000e+00 : f32
    %171 = vector.broadcast %cst_58 : f32 to vector<16x128xf32>
    %172 = arith.addf %171, %170 : vector<16x128xf32>
    %173 = arith.divf %171, %172 : vector<16x128xf32>
    %174 = vector.extract_strided_slice %167 {offsets = [0, 128], sizes = [16, 128], strides = [1, 1]} : vector<16x512xf32> to vector<16x128xf32>
    %175 = arith.negf %174 : vector<16x128xf32>
    %176 = math.exp %175 : vector<16x128xf32>
    %cst_59 = arith.constant 1.000000e+00 : f32
    %177 = vector.broadcast %cst_59 : f32 to vector<16x128xf32>
    %178 = arith.addf %177, %176 : vector<16x128xf32>
    %179 = arith.divf %177, %178 : vector<16x128xf32>
    %180 = vector.extract_strided_slice %167 {offsets = [0, 256], sizes = [16, 128], strides = [1, 1]} : vector<16x512xf32> to vector<16x128xf32>
    %181 = math.tanh %180 : vector<16x128xf32>
    %182 = vector.extract_strided_slice %167 {offsets = [0, 384], sizes = [16, 128], strides = [1, 1]} : vector<16x512xf32> to vector<16x128xf32>
    %183 = arith.negf %182 : vector<16x128xf32>
    %184 = math.exp %183 : vector<16x128xf32>
    %cst_60 = arith.constant 1.000000e+00 : f32
    %185 = vector.broadcast %cst_60 : f32 to vector<16x128xf32>
    %186 = arith.addf %185, %184 : vector<16x128xf32>
    %187 = arith.divf %185, %186 : vector<16x128xf32>
    %188 = arith.mulf %179, %153 : vector<16x128xf32>
    %189 = arith.mulf %173, %181 : vector<16x128xf32>
    %190 = arith.addf %188, %189 : vector<16x128xf32>
    %191 = math.tanh %190 : vector<16x128xf32>
    %192 = arith.mulf %187, %191 : vector<16x128xf32>
    %193 = arith.truncf %192 : vector<16x128xf32> to vector<16x128xbf16>
    %194 = arith.index_cast %c4_i32 : i32 to index
    %c0_61 = arith.constant 0 : index
    %c0_62 = arith.constant 0 : index
    %195 = vector.load %arg6[%194, %c0_61, %c0_62] : memref<8x16x128xbf16, #tpu.memory_space<vmem>>, vector<1x16x128xbf16>
    %196 = vector.shape_cast %195 : vector<1x16x128xbf16> to vector<16x128xbf16>
    %197 = vector.shape_cast %193 : vector<16x128xbf16> to vector<1x16x128xbf16>
    tpu.vector_store %arg6[%194, %c0_61, %c0_62], %197 {strides = array<i32>} : memref<8x16x128xbf16, #tpu.memory_space<vmem>>, vector<1x16x128xbf16>,
    %c5_i32 = arith.constant 5 : i32
    %c16_i32_63 = arith.constant 16 : i32
    %198 = arith.muli %c5_i32, %c16_i32_63 : i32
    %199 = arith.index_cast %198 : i32 to index
    %c0_64 = arith.constant 0 : index
    %200 = vector.load %arg9[%199, %c0_64] : memref<128x512xf32, #tpu.memory_space<vmem>>, vector<16x512xf32>
    %201 = arith.truncf %192 : vector<16x128xf32> to vector<16x128xbf16>
    %c0_65 = arith.constant 0 : index
    %c0_66 = arith.constant 0 : index
    %202 = vector.load %arg4[%c0_65, %c0_66] : memref<128x512xbf16, #tpu.memory_space<vmem>>, vector<128x512xbf16>
    %cst_67 = arith.constant dense<0.000000e+00> : vector<16x512xf32>
    %203 = tpu.matmul %201, %202, %cst_67 {dimension_numbers = #tpu.dot_dimension_numbers<[1], [0], [0], [1], [0, 0, 1, 1], [], []>} : vector<16x128xbf16>, vector<128x512xbf16>, vector<16x512xf32> -> vector<16x512xf32>
    %204 = arith.addf %200, %203 : vector<16x512xf32>
    %205 = vector.extract_strided_slice %204 {offsets = [0, 0], sizes = [16, 128], strides = [1, 1]} : vector<16x512xf32> to vector<16x128xf32>
    %206 = arith.negf %205 : vector<16x128xf32>
    %207 = math.exp %206 : vector<16x128xf32>
    %cst_68 = arith.constant 1.000000e+00 : f32
    %208 = vector.broadcast %cst_68 : f32 to vector<16x128xf32>
    %209 = arith.addf %208, %207 : vector<16x128xf32>
    %210 = arith.divf %208, %209 : vector<16x128xf32>
    %211 = vector.extract_strided_slice %204 {offsets = [0, 128], sizes = [16, 128], strides = [1, 1]} : vector<16x512xf32> to vector<16x128xf32>
    %212 = arith.negf %211 : vector<16x128xf32>
    %213 = math.exp %212 : vector<16x128xf32>
    %cst_69 = arith.constant 1.000000e+00 : f32
    %214 = vector.broadcast %cst_69 : f32 to vector<16x128xf32>
    %215 = arith.addf %214, %213 : vector<16x128xf32>
    %216 = arith.divf %214, %215 : vector<16x128xf32>
    %217 = vector.extract_strided_slice %204 {offsets = [0, 256], sizes = [16, 128], strides = [1, 1]} : vector<16x512xf32> to vector<16x128xf32>
    %218 = math.tanh %217 : vector<16x128xf32>
    %219 = vector.extract_strided_slice %204 {offsets = [0, 384], sizes = [16, 128], strides = [1, 1]} : vector<16x512xf32> to vector<16x128xf32>
    %220 = arith.negf %219 : vector<16x128xf32>
    %221 = math.exp %220 : vector<16x128xf32>
    %cst_70 = arith.constant 1.000000e+00 : f32
    %222 = vector.broadcast %cst_70 : f32 to vector<16x128xf32>
    %223 = arith.addf %222, %221 : vector<16x128xf32>
    %224 = arith.divf %222, %223 : vector<16x128xf32>
    %225 = arith.mulf %216, %190 : vector<16x128xf32>
    %226 = arith.mulf %210, %218 : vector<16x128xf32>
    %227 = arith.addf %225, %226 : vector<16x128xf32>
    %228 = math.tanh %227 : vector<16x128xf32>
    %229 = arith.mulf %224, %228 : vector<16x128xf32>
    %230 = arith.truncf %229 : vector<16x128xf32> to vector<16x128xbf16>
    %231 = arith.index_cast %c5_i32 : i32 to index
    %c0_71 = arith.constant 0 : index
    %c0_72 = arith.constant 0 : index
    %232 = vector.load %arg6[%231, %c0_71, %c0_72] : memref<8x16x128xbf16, #tpu.memory_space<vmem>>, vector<1x16x128xbf16>
    %233 = vector.shape_cast %232 : vector<1x16x128xbf16> to vector<16x128xbf16>
    %234 = vector.shape_cast %230 : vector<16x128xbf16> to vector<1x16x128xbf16>
    tpu.vector_store %arg6[%231, %c0_71, %c0_72], %234 {strides = array<i32>} : memref<8x16x128xbf16, #tpu.memory_space<vmem>>, vector<1x16x128xbf16>,
    %c6_i32 = arith.constant 6 : i32
    %c16_i32_73 = arith.constant 16 : i32
    %235 = arith.muli %c6_i32, %c16_i32_73 : i32
    %236 = arith.index_cast %235 : i32 to index
    %c0_74 = arith.constant 0 : index
    %237 = vector.load %arg9[%236, %c0_74] : memref<128x512xf32, #tpu.memory_space<vmem>>, vector<16x512xf32>
    %238 = arith.truncf %229 : vector<16x128xf32> to vector<16x128xbf16>
    %c0_75 = arith.constant 0 : index
    %c0_76 = arith.constant 0 : index
    %239 = vector.load %arg4[%c0_75, %c0_76] : memref<128x512xbf16, #tpu.memory_space<vmem>>, vector<128x512xbf16>
    %cst_77 = arith.constant dense<0.000000e+00> : vector<16x512xf32>
    %240 = tpu.matmul %238, %239, %cst_77 {dimension_numbers = #tpu.dot_dimension_numbers<[1], [0], [0], [1], [0, 0, 1, 1], [], []>} : vector<16x128xbf16>, vector<128x512xbf16>, vector<16x512xf32> -> vector<16x512xf32>
    %241 = arith.addf %237, %240 : vector<16x512xf32>
    %242 = vector.extract_strided_slice %241 {offsets = [0, 0], sizes = [16, 128], strides = [1, 1]} : vector<16x512xf32> to vector<16x128xf32>
    %243 = arith.negf %242 : vector<16x128xf32>
    %244 = math.exp %243 : vector<16x128xf32>
    %cst_78 = arith.constant 1.000000e+00 : f32
    %245 = vector.broadcast %cst_78 : f32 to vector<16x128xf32>
    %246 = arith.addf %245, %244 : vector<16x128xf32>
    %247 = arith.divf %245, %246 : vector<16x128xf32>
    %248 = vector.extract_strided_slice %241 {offsets = [0, 128], sizes = [16, 128], strides = [1, 1]} : vector<16x512xf32> to vector<16x128xf32>
    %249 = arith.negf %248 : vector<16x128xf32>
    %250 = math.exp %249 : vector<16x128xf32>
    %cst_79 = arith.constant 1.000000e+00 : f32
    %251 = vector.broadcast %cst_79 : f32 to vector<16x128xf32>
    %252 = arith.addf %251, %250 : vector<16x128xf32>
    %253 = arith.divf %251, %252 : vector<16x128xf32>
    %254 = vector.extract_strided_slice %241 {offsets = [0, 256], sizes = [16, 128], strides = [1, 1]} : vector<16x512xf32> to vector<16x128xf32>
    %255 = math.tanh %254 : vector<16x128xf32>
    %256 = vector.extract_strided_slice %241 {offsets = [0, 384], sizes = [16, 128], strides = [1, 1]} : vector<16x512xf32> to vector<16x128xf32>
    %257 = arith.negf %256 : vector<16x128xf32>
    %258 = math.exp %257 : vector<16x128xf32>
    %cst_80 = arith.constant 1.000000e+00 : f32
    %259 = vector.broadcast %cst_80 : f32 to vector<16x128xf32>
    %260 = arith.addf %259, %258 : vector<16x128xf32>
    %261 = arith.divf %259, %260 : vector<16x128xf32>
    %262 = arith.mulf %253, %227 : vector<16x128xf32>
    %263 = arith.mulf %247, %255 : vector<16x128xf32>
    %264 = arith.addf %262, %263 : vector<16x128xf32>
    %265 = math.tanh %264 : vector<16x128xf32>
    %266 = arith.mulf %261, %265 : vector<16x128xf32>
    %267 = arith.truncf %266 : vector<16x128xf32> to vector<16x128xbf16>
    %268 = arith.index_cast %c6_i32 : i32 to index
    %c0_81 = arith.constant 0 : index
    %c0_82 = arith.constant 0 : index
    %269 = vector.load %arg6[%268, %c0_81, %c0_82] : memref<8x16x128xbf16, #tpu.memory_space<vmem>>, vector<1x16x128xbf16>
    %270 = vector.shape_cast %269 : vector<1x16x128xbf16> to vector<16x128xbf16>
    %271 = vector.shape_cast %267 : vector<16x128xbf16> to vector<1x16x128xbf16>
    tpu.vector_store %arg6[%268, %c0_81, %c0_82], %271 {strides = array<i32>} : memref<8x16x128xbf16, #tpu.memory_space<vmem>>, vector<1x16x128xbf16>,
    %c7_i32 = arith.constant 7 : i32
    %c16_i32_83 = arith.constant 16 : i32
    %272 = arith.muli %c7_i32, %c16_i32_83 : i32
    %273 = arith.index_cast %272 : i32 to index
    %c0_84 = arith.constant 0 : index
    %274 = vector.load %arg9[%273, %c0_84] : memref<128x512xf32, #tpu.memory_space<vmem>>, vector<16x512xf32>
    %275 = arith.truncf %266 : vector<16x128xf32> to vector<16x128xbf16>
    %c0_85 = arith.constant 0 : index
    %c0_86 = arith.constant 0 : index
    %276 = vector.load %arg4[%c0_85, %c0_86] : memref<128x512xbf16, #tpu.memory_space<vmem>>, vector<128x512xbf16>
    %cst_87 = arith.constant dense<0.000000e+00> : vector<16x512xf32>
    %277 = tpu.matmul %275, %276, %cst_87 {dimension_numbers = #tpu.dot_dimension_numbers<[1], [0], [0], [1], [0, 0, 1, 1], [], []>} : vector<16x128xbf16>, vector<128x512xbf16>, vector<16x512xf32> -> vector<16x512xf32>
    %278 = arith.addf %274, %277 : vector<16x512xf32>
    %279 = vector.extract_strided_slice %278 {offsets = [0, 0], sizes = [16, 128], strides = [1, 1]} : vector<16x512xf32> to vector<16x128xf32>
    %280 = arith.negf %279 : vector<16x128xf32>
    %281 = math.exp %280 : vector<16x128xf32>
    %cst_88 = arith.constant 1.000000e+00 : f32
    %282 = vector.broadcast %cst_88 : f32 to vector<16x128xf32>
    %283 = arith.addf %282, %281 : vector<16x128xf32>
    %284 = arith.divf %282, %283 : vector<16x128xf32>
    %285 = vector.extract_strided_slice %278 {offsets = [0, 128], sizes = [16, 128], strides = [1, 1]} : vector<16x512xf32> to vector<16x128xf32>
    %286 = arith.negf %285 : vector<16x128xf32>
    %287 = math.exp %286 : vector<16x128xf32>
    %cst_89 = arith.constant 1.000000e+00 : f32
    %288 = vector.broadcast %cst_89 : f32 to vector<16x128xf32>
    %289 = arith.addf %288, %287 : vector<16x128xf32>
    %290 = arith.divf %288, %289 : vector<16x128xf32>
    %291 = vector.extract_strided_slice %278 {offsets = [0, 256], sizes = [16, 128], strides = [1, 1]} : vector<16x512xf32> to vector<16x128xf32>
    %292 = math.tanh %291 : vector<16x128xf32>
    %293 = vector.extract_strided_slice %278 {offsets = [0, 384], sizes = [16, 128], strides = [1, 1]} : vector<16x512xf32> to vector<16x128xf32>
    %294 = arith.negf %293 : vector<16x128xf32>
    %295 = math.exp %294 : vector<16x128xf32>
    %cst_90 = arith.constant 1.000000e+00 : f32
    %296 = vector.broadcast %cst_90 : f32 to vector<16x128xf32>
    %297 = arith.addf %296, %295 : vector<16x128xf32>
    %298 = arith.divf %296, %297 : vector<16x128xf32>
    %299 = arith.mulf %290, %264 : vector<16x128xf32>
    %300 = arith.mulf %284, %292 : vector<16x128xf32>
    %301 = arith.addf %299, %300 : vector<16x128xf32>
    %302 = math.tanh %301 : vector<16x128xf32>
    %303 = arith.mulf %298, %302 : vector<16x128xf32>
    %304 = arith.truncf %303 : vector<16x128xf32> to vector<16x128xbf16>
    %305 = arith.index_cast %c7_i32 : i32 to index
    %c0_91 = arith.constant 0 : index
    %c0_92 = arith.constant 0 : index
    %306 = vector.load %arg6[%305, %c0_91, %c0_92] : memref<8x16x128xbf16, #tpu.memory_space<vmem>>, vector<1x16x128xbf16>
    %307 = vector.shape_cast %306 : vector<1x16x128xbf16> to vector<16x128xbf16>
    %308 = vector.shape_cast %304 : vector<16x128xbf16> to vector<1x16x128xbf16>
    tpu.vector_store %arg6[%305, %c0_91, %c0_92], %308 {strides = array<i32>} : memref<8x16x128xbf16, #tpu.memory_space<vmem>>, vector<1x16x128xbf16>,
    %c8_i32 = arith.constant 8 : i32
    %c0_93 = arith.constant 0 : index
    %c0_94 = arith.constant 0 : index
    %309 = vector.load %arg7[%c0_93, %c0_94] : memref<16x128xf32, #tpu.memory_space<vmem>>, vector<16x128xf32>
    tpu.vector_store %arg7[%c0_93, %c0_94], %303 {strides = array<i32>} : memref<16x128xf32, #tpu.memory_space<vmem>>, vector<16x128xf32>,
    %c0_95 = arith.constant 0 : index
    %c0_96 = arith.constant 0 : index
    %310 = vector.load %arg8[%c0_95, %c0_96] : memref<16x128xf32, #tpu.memory_space<vmem>>, vector<16x128xf32>
    tpu.vector_store %arg8[%c0_95, %c0_96], %301 {strides = array<i32>} : memref<16x128xf32, #tpu.memory_space<vmem>>, vector<16x128xf32>,
    return
  }
  func.func @transform_0(%arg0: i32, %arg1: i32) -> (i32, i32, i32) {
    %c0_i32 = arith.constant 0 : i32
    %c0_i32_0 = arith.constant 0 : i32
    return %arg1, %arg0, %c0_i32 : i32, i32, i32
  }
  func.func @transform_1(%arg0: i32, %arg1: i32) -> (i32, i32) {
    %c0_i32 = arith.constant 0 : i32
    %c0_i32_0 = arith.constant 0 : i32
    %c0_i32_1 = arith.constant 0 : i32
    return %c0_i32, %c0_i32_0 : i32, i32
  }
  func.func @transform_2(%arg0: i32, %arg1: i32) -> (i32, i32) {
    %c0_i32 = arith.constant 0 : i32
    %c0_i32_0 = arith.constant 0 : i32
    %c0_i32_1 = arith.constant 0 : i32
    return %c0_i32, %c0_i32_0 : i32, i32
  }
  func.func @transform_3(%arg0: i32, %arg1: i32) -> (i32, i32) {
    %c0_i32 = arith.constant 0 : i32
    %c0_i32_0 = arith.constant 0 : i32
    %c0_i32_1 = arith.constant 0 : i32
    return %c0_i32, %c0_i32_0 : i32, i32
  }
  func.func @transform_4(%arg0: i32, %arg1: i32) -> (i32, i32, i32) {
    %c0_i32 = arith.constant 0 : i32
    %c0_i32_0 = arith.constant 0 : i32
    return %arg1, %arg0, %c0_i32 : i32, i32, i32
  }
}

</mosaic_0001>

<bundles_post_ra>
// kernel: tpu_custom_call.1
= control target key start
LH: loop header
LB: loop body
LE: loop exit
PB: predicated region body
PF: predicated region fallthrough
CT: control target
= control target key end

     0   :  { %9 = vsyncpa [#allocation6], 0  ;;  %s5214_s0 = inlined_call_operand.hbm [shape: bf16[8,16,128], index: 0, kind: input, shape index: {}]   ;;  %s5215_s1 = inlined_call_operand.hbm [shape: bf16[128,512], index: 1, kind: input, shape index: {}]   ;;  %s5216_s2 = inlined_call_operand.hbm [shape: bf16[128,512], index: 2, kind: input, shape index: {}]   ;;  %s5217_s3 = inlined_call_operand.vmem [shape: f32[1,512], index: 3, kind: input, shape index: {}]   ;;  %s5218_s4 = inlined_call_operand.hbm [shape: bf16[8,16,128], index: 4, kind: output, shape index: {}]  }
   0x1   :  { %10 = vsyncpa [#allocation9], 0 }
   0x2   :  { %11 = vsyncpa [#allocation7], 0  ;;  %s4454_s15 = smov [#allocation8]  }
   0x3   :  { %s29_s16 = sshll.u32 %s4454_s15, 4  ;;  %s30_s16 = int_to_ptr.vmem [resolvable:$true] %s29_s16 }
   0x4   :  { %s4376_s17 = scalar_lea.vmem %s30_s16, 4096  ;;  %p4381_p1 = scmp.lt.s32.totalorder %s30_s16, %s30_s16 }
   0x5   :  { %p4377_p0 = scmp.ne.s32.totalorder %s30_s16, %s4376_s17  ;;  %p4382_p2 = scmp.lt.s32.totalorder %s4376_s17, %s4376_s17 }
   0x7   :  { %p4383_p3 = por %p4382_p2, %p4381_p1 }
   0x9   :  { %p4384_p4 = pnand %p4383_p3, %p4377_p0 }
   0xb   :  { %4387 = shalt.err (!%p4384_p4)
}
   0xc   :  { %s4455_s18 = smov 256   ;;  %s4456_s19 = smov 16  }
   0xd   :  { %35 = dma.hbm_to_vmem [thread:$0]  %s5215_s1, 4096, %s30_s16, [#allocation9], %s4455_s18, %s4455_s18, %s4456_s19  }
   0xe   :  { %s4457_s22 = smov [#allocation5]  }
   0xf   :  { %s17_s23 = sshll.u32 %s4457_s22, 4  ;;  %s18_s23 = int_to_ptr.vmem [resolvable:$true] %s17_s23 }
  0x10   :  { %s4396_s24 = scalar_lea.vmem %s18_s23, 1024  ;;  %p4401_p6 = scmp.lt.s32.totalorder %s18_s23, %s18_s23 }
  0x11   :  { %p4397_p5 = scmp.ne.s32.totalorder %s18_s23, %s4396_s24  ;;  %p4402_p7 = scmp.lt.s32.totalorder %s4396_s24, %s4396_s24 }
  0x13   :  { %p4403_p8 = por %p4402_p7, %p4401_p6 }
  0x15   :  { %p4404_p9 = pnand %p4403_p8, %p4397_p5 }
  0x17   :  { %4407 = shalt.err (!%p4404_p9)
}
  0x18   :  { %s4458_s25 = smov 64   ;;  %s4459_s26 = smov 4  }
  0x19   :  { %23 = dma.hbm_to_vmem [thread:$0]  %s5214_s0, 1024, %s18_s23, [#allocation6], %s4458_s25, %s4458_s25, %s4459_s26  }
  0x1a   :  { %s4460_s1 = smov [#allocation10]  }
  0x1b   :  { %s41_s29 = sshll.u32 %s4460_s1, 4  ;;  %s42_s29 = int_to_ptr.vmem [resolvable:$true] %s41_s29 }
  0x1c   :  { %s4416_s30 = scalar_lea.vmem %s42_s29, 4096  ;;  %p4421_p11 = scmp.lt.s32.totalorder %s42_s29, %s42_s29 }
  0x1d   :  { %p4417_p10 = scmp.ne.s32.totalorder %s42_s29, %s4416_s30  ;;  %p4422_p12 = scmp.lt.s32.totalorder %s4416_s30, %s4416_s30 }
  0x1f   :  { %p4423_p13 = por %p4422_p12, %p4421_p11 }
  0x21   :  { %p4424_p0 = pnand %p4423_p13, %p4417_p10 }
  0x23   :  { %4427 = shalt.err (!%p4424_p0)
}
  0x24   :  { %47 = dma.hbm_to_vmem [thread:$0]  %s5216_s2, 4096, %s42_s29, [#allocation9], %s4455_s18, %s4455_s18, %s4456_s19  }
  0x25   :  { %4448 = dma.done.wait [#allocation6], 1024  }
  0x26   :  { %4449 = vsyncadd [#allocation6], 4294966272 }
  0x27   :  { %4450 = dma.done.wait [#allocation9], 8192  }
  0x28   :  { %4451 = vsyncadd [#allocation9], 4294959104  ;;  %v5219_v0 = vmov 0   ;;  %v3912_v1 = vld [vmem:[#allocation8 + $0xe4] ss:$16 sps:$4 sm:$0xff]   ;;  %v3964_v43 = vld [vmem:[#allocation5 + $0x8] sm:$0xff]  }
  0x29   :  { %378 = vmatprep.mubr.bf16.mxu0 %v5219_v0  ;;  %491 = vmatprep.mubr.bf16.mxu1 %v5219_v0  ;;  %v3914_v2 = vld [vmem:[#allocation8 + $0xec] ss:$16 sps:$4 sm:$0xff]   ;;  %v3916_v3 = vld [vmem:[#allocation8 + $0xe0] ss:$16 sps:$4 sm:$0xff]   ;;  %v3917_v4 = vld [vmem:[#allocation8 + $0xe8] ss:$16 sps:$4 sm:$0xff]  }
  0x2a   :  { %346 = vmatprep.subr.bf16.mxu0 %v3912_v1  ;;  %459 = vmatprep.subr.bf16.mxu1 %v3914_v2  ;;  %v3918_v5 = vld [vmem:[#allocation8 + $0xc4] ss:$16 sps:$4 sm:$0xff]   ;;  %v3920_v6 = vld [vmem:[#allocation8 + $0xcc] ss:$16 sps:$4 sm:$0xff]   ;;  %v3922_v7 = vld [vmem:[#allocation8 + $0xc0] ss:$16 sps:$4 sm:$0xff]  }
  0x2b   :  { %347 = vmatpush1.bf16.msra.mxu0 %v3916_v3  ;;  %460 = vmatpush1.bf16.msra.mxu1 %v3917_v4  ;;  %v3923_v8 = vld [vmem:[#allocation8 + $0xc8] ss:$16 sps:$4 sm:$0xff]   ;;  %v3924_v9 = vld [vmem:[#allocation8 + $0xa4] ss:$16 sps:$4 sm:$0xff]   ;;  %v3926_v10 = vld [vmem:[#allocation8 + $0xac] ss:$16 sps:$4 sm:$0xff]  }
  0x2c   :  { %348 = vmatprep.subr.bf16.mxu0 %v3918_v5  ;;  %461 = vmatprep.subr.bf16.mxu1 %v3920_v6  ;;  %v3928_v11 = vld [vmem:[#allocation8 + $0xa0] ss:$16 sps:$4 sm:$0xff]   ;;  %v3929_v12 = vld [vmem:[#allocation8 + $0xa8] ss:$16 sps:$4 sm:$0xff]   ;;  %v3930_v13 = vld [vmem:[#allocation8 + $0x84] ss:$16 sps:$4 sm:$0xff]  }
  0x2d   :  { %v3932_v14 = vld [vmem:[#allocation8 + $0x8c] ss:$16 sps:$4 sm:$0xff]   ;;  %v3934_v15 = vld [vmem:[#allocation8 + $0x80] ss:$16 sps:$4 sm:$0xff]   ;;  %v3935_v16 = vld [vmem:[#allocation8 + $0x88] ss:$16 sps:$4 sm:$0xff]  }
  0x2e   :  { %v3936_v17 = vld [vmem:[#allocation8 + $0x64] ss:$16 sps:$4 sm:$0xff]   ;;  %v3938_v18 = vld [vmem:[#allocation8 + $0x6c] ss:$16 sps:$4 sm:$0xff]   ;;  %v3940_v19 = vld [vmem:[#allocation8 + $0x60] ss:$16 sps:$4 sm:$0xff]  }
  0x2f   :  { %349 = vmatpush1.bf16.msra.mxu0 %v3922_v7  ;;  %462 = vmatpush1.bf16.msra.mxu1 %v3923_v8  ;;  %v3941_v20 = vld [vmem:[#allocation8 + $0x68] ss:$16 sps:$4 sm:$0xff]   ;;  %v3942_v21 = vld [vmem:[#allocation8 + $0x44] ss:$16 sps:$4 sm:$0xff]   ;;  %v3944_v22 = vld [vmem:[#allocation8 + $0x4c] ss:$16 sps:$4 sm:$0xff]  }
  0x30   :  { %350 = vmatprep.subr.bf16.mxu0 %v3924_v9  ;;  %463 = vmatprep.subr.bf16.mxu1 %v3926_v10  ;;  %v3946_v23 = vld [vmem:[#allocation8 + $0x40] ss:$16 sps:$4 sm:$0xff]   ;;  %v3947_v24 = vld [vmem:[#allocation8 + $0x48] ss:$16 sps:$4 sm:$0xff]   ;;  %v3948_v25 = vld [vmem:[#allocation8 + $0x24] ss:$16 sps:$4 sm:$0xff]  }
  0x31   :  { %v3950_v26 = vld [vmem:[#allocation8 + $0x2c] ss:$16 sps:$4 sm:$0xff]   ;;  %v3952_v27 = vld [vmem:[#allocation8 + $0x20] ss:$16 sps:$4 sm:$0xff]   ;;  %v3953_v28 = vld [vmem:[#allocation8 + $0x28] ss:$16 sps:$4 sm:$0xff]  }
  0x32   :  { %v3954_v29 = vld [vmem:[#allocation8 + $0x4] ss:$16 sps:$4 sm:$0xff]   ;;  %v3956_v30 = vld [vmem:[#allocation8 + $0xc] ss:$16 sps:$4 sm:$0xff]   ;;  %v3958_v31 = vld [vmem:[#allocation8] ss:$16 sps:$4 sm:$0xff]  }
  0x33   :  { %351 = vmatpush1.bf16.msra.mxu0 %v3928_v11  ;;  %464 = vmatpush1.bf16.msra.mxu1 %v3929_v12  ;;  %v3959_v32 = vld [vmem:[#allocation8 + $0x8] ss:$16 sps:$4 sm:$0xff]   ;;  %v4503_v33 = vld [vmem:[#allocation10 + $0xe4] ss:$16 sps:$4 sm:$0xff]   ;;  %v4505_v34 = vld [vmem:[#allocation10 + $0xec] ss:$16 sps:$4 sm:$0xff]   ;;  %v118_v11 = vlaneseq }
  0x34   :  { %352 = vmatprep.subr.bf16.mxu0 %v3930_v13  ;;  %465 = vmatprep.subr.bf16.mxu1 %v3932_v14  ;;  %v3960_v35 = vld [vmem:[#allocation5] sm:$0xff]   ;;  %v4513_v38 = vld [vmem:[#allocation10 + $0xe8] ss:$16 sps:$4 sm:$0xff]   ;;  %v4515_v39 = vld [vmem:[#allocation10 + $0xcc] ss:$16 sps:$4 sm:$0xff]   ;;  %v4462_v10 = vmov 0.0|0.0  }
  0x35   :  { %v4507_v36 = vld [vmem:[#allocation10 + $0xe0] ss:$16 sps:$4 sm:$0xff]   ;;  %v4510_v37 = vld [vmem:[#allocation10 + $0xc4] ss:$16 sps:$4 sm:$0xff]   ;;  %v4526_v42 = vld [vmem:[#allocation10 + $0xc8] ss:$16 sps:$4 sm:$0xff]  }
  0x36   :  { %v4519_v40 = vld [vmem:[#allocation10 + $0xc0] ss:$16 sps:$4 sm:$0xff]   ;;  %v4523_v41 = vld [vmem:[#allocation10 + $0xa4] ss:$16 sps:$4 sm:$0xff]   ;;  %v4533_v45 = vld [vmem:[#allocation10 + $0xac] ss:$16 sps:$4 sm:$0xff]  }
  0x37   :  { %353 = vmatpush1.bf16.msra.mxu0 %v3934_v15  ;;  %466 = vmatpush1.bf16.msra.mxu1 %v3935_v16  ;;  %v4530_v44 = vld [vmem:[#allocation10 + $0xa0] ss:$16 sps:$4 sm:$0xff]   ;;  %v4535_v46 = vld [vmem:[#allocation10 + $0x84] ss:$16 sps:$4 sm:$0xff]   ;;  %v4538_v47 = vld [vmem:[#allocation10 + $0xa8] ss:$16 sps:$4 sm:$0xff]  }
  0x38   :  { %354 = vmatprep.subr.bf16.mxu0 %v3936_v17  ;;  %467 = vmatprep.subr.bf16.mxu1 %v3938_v18  ;;  %v4540_v48 = vld [vmem:[#allocation10 + $0x8c] ss:$16 sps:$4 sm:$0xff]   ;;  %v4545_v49 = vld [vmem:[#allocation10 + $0x80] ss:$16 sps:$4 sm:$0xff]   ;;  %v4547_v50 = vld [vmem:[#allocation10 + $0x64] ss:$16 sps:$4 sm:$0xff]  }
  0x39   :  { %v4552_v51 = vld [vmem:[#allocation10 + $0x88] ss:$16 sps:$4 sm:$0xff]   ;;  %v3968_v52 = vld [vmem:[#allocation5 + $0x10] sm:$0xff]   ;;  %v4558_v54 = vld [vmem:[#allocation10 + $0x6c] ss:$16 sps:$4 sm:$0xff]   ;;  %v119_v12 = vshrl.u32 %v118_v11, 7 }
  0x3a   :  { %v4555_v53 = vld [vmem:[#allocation10 + $0x60] ss:$16 sps:$4 sm:$0xff]   ;;  %v4561_v55 = vld [vmem:[#allocation10 + $0x44] ss:$16 sps:$4 sm:$0xff]   ;;  %v4564_v56 = vld [vmem:[#allocation10 + $0x68] ss:$16 sps:$4 sm:$0xff]  }
  0x3b   :  { %355 = vmatpush1.bf16.msra.mxu0 %v3940_v19  ;;  %468 = vmatpush1.bf16.msra.mxu1 %v3941_v20  ;;  %v4566_v57 = vld [vmem:[#allocation10 + $0x4c] ss:$16 sps:$4 sm:$0xff]   ;;  %v4568_v58 = vld [vmem:[#allocation10 + $0x40] ss:$16 sps:$4 sm:$0xff]   ;;  %v4572_v59 = vld [vmem:[#allocation10 + $0x24] ss:$16 sps:$4 sm:$0xff]  }
  0x3c   :  { %356 = vmatprep.subr.bf16.mxu0 %v3942_v21  ;;  %469 = vmatprep.subr.bf16.mxu1 %v3944_v22  ;;  %v4574_v60 = vld [vmem:[#allocation10 + $0x48] ss:$16 sps:$4 sm:$0xff]   ;;  %v4580_v62 = vld [vmem:[#allocation10 + $0x20] ss:$16 sps:$4 sm:$0xff]   ;;  %v4583_v63 = vld [vmem:[#allocation10 + $0x2c] ss:$16 sps:$4 sm:$0xff]  }
  0x3d   :  { %v3975_v61 = vld [vmem:[#allocation5 + $0x18] sm:$0xff]   ;;  %v4585_v1 = vld [vmem:[#allocation10 + $0x4] ss:$16 sps:$4 sm:$0xff]   ;;  %v4594_v4 = vld [vmem:[#allocation10] ss:$16 sps:$4 sm:$0xff]   ;;  %v120_v17 = vsub.s32 0, %v119_v12 }
  0x3e   :  { %v4587_v2 = vld [vmem:[#allocation10 + $0x28] ss:$16 sps:$4 sm:$0xff]   ;;  %v4590_v3 = vld [vmem:[#allocation10 + $0xc] ss:$16 sps:$4 sm:$0xff]   ;;  %v3982_v6 = vld [vmem:[#allocation5 + $0x20] sm:$0xff]   ;;  %v128_v18 = vsub.s32 2, %v119_v12 }
  0x3f   :  { %357 = vmatpush1.bf16.msra.mxu0 %v3946_v23  ;;  %470 = vmatpush1.bf16.msra.mxu1 %v3947_v24  ;;  %v4598_v5 = vld [vmem:[#allocation10 + $0x8] ss:$16 sps:$4 sm:$0xff]   ;;  %v3996_v8 = vld [vmem:[#allocation5 + $0x30] sm:$0xff]   ;;  %v116_v19 = vld [vmem:[%s5217_s3] sm:$0xf]  ;;  %v124_v22 = vsub.s32 1, %v119_v12 }
  0x40   :  { %358 = vmatprep.subr.bf16.mxu0 %v3948_v25  ;;  %471 = vmatprep.subr.bf16.mxu1 %v3950_v26  ;;  %v3989_v7 = vld [vmem:[#allocation5 + $0x28] sm:$0xff]   ;;  %v4006_v9 = vld [vmem:[#allocation5 + $0x38] sm:$0xff]   ;;  %v132_v23 = vsub.s32 3, %v119_v12  ;;  %v4670_v26 = vrot.slane %v116_v19, %v120_v17  ;;  %s4463_s3 = smov [#allocation11]  }
  0x41   :  { %s3473_s7 = sshll.u32 %s4463_s3, 4  ;;  %s3474_s7 = int_to_ptr.vmem [resolvable:$true] %s3473_s7 }
  0x42   :  { %s4428_s8 = scalar_lea.vmem %s3474_s7, 1024  ;;  %p4433_p2 = scmp.lt.s32.totalorder %s3474_s7, %s3474_s7 }
  0x43   :  { %359 = vmatpush1.bf16.msra.mxu0 %v3952_v27  ;;  %472 = vmatpush1.bf16.msra.mxu1 %v3953_v28  ;;  %v4672_v27 = vrot.slane %v116_v19, %v128_v18  ;;  %p4429_p1 = scmp.ne.s32.totalorder %s3474_s7, %s4428_s8  ;;  %p4434_p3 = scmp.lt.s32.totalorder %s4428_s8, %s4428_s8 }
  0x44   :  { %360 = vmatprep.subr.bf16.mxu0 %v3954_v29  ;;  %473 = vmatprep.subr.bf16.mxu1 %v3956_v30  ;;  %v4674_v30 = vrot.slane %v116_v19, %v124_v22 }
  0x45   :  { %p4435_p4 = por %p4434_p3, %p4433_p2 }
  0x47   :  { %361 = vmatpush1.bf16.msra.mxu0 %v3958_v31  ;;  %474 = vmatpush1.bf16.msra.mxu1 %v3959_v32  ;;  %v4676_v31 = vrot.slane %v116_v19, %v132_v23  ;;  %p4436_p5 = pnand %p4435_p4, %p4429_p1 }
  0x48   :  { %841 = vmatprep.subr.bf16.mxu0 %v4503_v33  ;;  %884 = vmatprep.subr.bf16.mxu1 %v4505_v34 }
  0x4a   :  { %379 = vmatmul.mubr.bf16.vlgmr.msra.gmra.mxu0 %v3960_v35  ;;  %492 = vmatmul.mubr.bf16.vlgmr.msra.gmra.mxu1 %v3960_v35 }
  0x4b   :  { %842 = vmatpush1.bf16.msra.mxu0 %v4507_v36  ;;  %388 = vmatprep.mubr.bf16.mxu0 %v5219_v0 }
  0x4c   :  { %501 = vmatprep.mubr.bf16.mxu1 %v5219_v0  ;;  %843 = vmatprep.subr.bf16.mxu0 %v4510_v37 }
  0x4d   :  { %885 = vmatpush1.bf16.msra.mxu1 %v4513_v38 }
  0x4e   :  { %886 = vmatprep.subr.bf16.mxu1 %v4515_v39 }
  0x4f   :  { %844 = vmatpush1.bf16.msra.mxu0 %v4519_v40 }
  0x50   :  { %845 = vmatprep.subr.bf16.mxu0 %v4523_v41 }
  0x51   :  { %887 = vmatpush1.bf16.msra.mxu1 %v4526_v42 }
  0x52   :  { %389 = vmatmul.mubr.bf16.gmra.mxu0 %v3964_v43  ;;  %502 = vmatmul.mubr.bf16.gmra.mxu1 %v3964_v43 }
  0x53   :  { %398 = vmatprep.mubr.bf16.mxu0 %v5219_v0  ;;  %511 = vmatprep.mubr.bf16.mxu1 %v5219_v0 }
  0x54   :  { %846 = vmatpush1.bf16.msra.mxu0 %v4530_v44  ;;  %888 = vmatprep.subr.bf16.mxu1 %v4533_v45 }
  0x55   :  { %847 = vmatprep.subr.bf16.mxu0 %v4535_v46  ;;  %889 = vmatpush1.bf16.msra.mxu1 %v4538_v47 }
  0x56   :  { %890 = vmatprep.subr.bf16.mxu1 %v4540_v48 }
  0x58   :  { %848 = vmatpush1.bf16.msra.mxu0 %v4545_v49 }
  0x59   :  { %849 = vmatprep.subr.bf16.mxu0 %v4547_v50  ;;  %891 = vmatpush1.bf16.msra.mxu1 %v4552_v51 }
  0x5a   :  { %399 = vmatmul.mubr.bf16.gmra.mxu0 %v3968_v52  ;;  %512 = vmatmul.mubr.bf16.gmra.mxu1 %v3968_v52 }
  0x5b   :  { %408 = vmatprep.mubr.bf16.mxu0 %v5219_v0  ;;  %521 = vmatprep.mubr.bf16.mxu1 %v5219_v0 }
  0x5c   :  { %850 = vmatpush1.bf16.msra.mxu0 %v4555_v53  ;;  %892 = vmatprep.subr.bf16.mxu1 %v4558_v54 }
  0x5d   :  { %851 = vmatprep.subr.bf16.mxu0 %v4561_v55  ;;  %893 = vmatpush1.bf16.msra.mxu1 %v4564_v56 }
  0x5e   :  { %894 = vmatprep.subr.bf16.mxu1 %v4566_v57 }
  0x60   :  { %852 = vmatpush1.bf16.msra.mxu0 %v4568_v58 }
  0x61   :  { %853 = vmatprep.subr.bf16.mxu0 %v4572_v59  ;;  %895 = vmatpush1.bf16.msra.mxu1 %v4574_v60 }
  0x62   :  { %409 = vmatmul.mubr.bf16.gmra.mxu0 %v3975_v61  ;;  %522 = vmatmul.mubr.bf16.gmra.mxu1 %v3975_v61 }
  0x63   :  { %418 = vmatprep.mubr.bf16.mxu0 %v5219_v0  ;;  %531 = vmatprep.mubr.bf16.mxu1 %v5219_v0 }
  0x64   :  { %854 = vmatpush1.bf16.msra.mxu0 %v4580_v62  ;;  %896 = vmatprep.subr.bf16.mxu1 %v4583_v63 }
  0x65   :  { %855 = vmatprep.subr.bf16.mxu0 %v4585_v1  ;;  %897 = vmatpush1.bf16.msra.mxu1 %v4587_v2 }
  0x66   :  { %898 = vmatprep.subr.bf16.mxu1 %v4590_v3 }
  0x68   :  { %856 = vmatpush1.bf16.msra.mxu0 %v4594_v4 }
  0x69   :  { %899 = vmatpush1.bf16.msra.mxu1 %v4598_v5  ;;  %1193 = vmatprep.subr.bf16.mxu0 %v4503_v33 }
  0x6a   :  { %419 = vmatmul.mubr.bf16.gmra.mxu0 %v3982_v6  ;;  %532 = vmatmul.mubr.bf16.gmra.mxu1 %v3982_v6 }
  0x6b   :  { %428 = vmatprep.mubr.bf16.mxu0 %v5219_v0  ;;  %541 = vmatprep.mubr.bf16.mxu1 %v5219_v0 }
  0x6c   :  { %1236 = vmatprep.subr.bf16.mxu1 %v4505_v34 }
  0x72   :  { %429 = vmatmul.mubr.bf16.gmra.mxu0 %v3989_v7  ;;  %542 = vmatmul.mubr.bf16.gmra.mxu1 %v3989_v7 }
  0x73   :  { %438 = vmatprep.mubr.bf16.mxu0 %v5219_v0  ;;  %551 = vmatprep.mubr.bf16.mxu1 %v5219_v0 }
  0x7a   :  { %439 = vmatmul.mubr.bf16.gmra.mxu0 %v3996_v8  ;;  %552 = vmatmul.mubr.bf16.gmra.mxu1 %v3996_v8 }
  0x7b   :  { %448 = vmatprep.mubr.bf16.mxu0 %v5219_v0  ;;  %561 = vmatprep.mubr.bf16.mxu1 %v5219_v0 }
  0x82   :  { %449 = vmatmul.mubr.bf16.gmra.mxu0 %v4006_v9  ;;  %562 = vmatmul.mubr.bf16.gmra.mxu1 %v4006_v9 }
  0x83   :  { %873 = vmatprep.mubr.bf16.mxu0 %v5219_v0  ;;  %916 = vmatprep.mubr.bf16.mxu1 %v5219_v0 }
  0x8a   :  { %874 = vmatmul.mubr.bf16.vlgmr.msra.gmra.mxu0 %v4462_v10  ;;  %917 = vmatmul.mubr.bf16.vlgmr.msra.gmra.mxu1 %v4462_v10 }
  0x8b   :  { %1194 = vmatpush1.bf16.msra.mxu0 %v4507_v36  ;;  %1237 = vmatpush1.bf16.msra.mxu1 %v4513_v38 }
  0x8c   :  { %1195 = vmatprep.subr.bf16.mxu0 %v4510_v37  ;;  %1238 = vmatprep.subr.bf16.mxu1 %v4515_v39 }
  0x8d   :  { %1225 = vmatprep.mubr.bf16.mxu0 %v5219_v0  ;;  %1268 = vmatprep.mubr.bf16.mxu1 %v5219_v0 }
  0x8f   :  { %1196 = vmatpush1.bf16.msra.mxu0 %v4519_v40  ;;  %1239 = vmatpush1.bf16.msra.mxu1 %v4526_v42 }
  0x90   :  { %1197 = vmatprep.subr.bf16.mxu0 %v4523_v41  ;;  %1240 = vmatprep.subr.bf16.mxu1 %v4533_v45 }
  0x93   :  { %1198 = vmatpush1.bf16.msra.mxu0 %v4530_v44  ;;  %1241 = vmatpush1.bf16.msra.mxu1 %v4538_v47 }
  0x94   :  { %1199 = vmatprep.subr.bf16.mxu0 %v4535_v46  ;;  %1242 = vmatprep.subr.bf16.mxu1 %v4540_v48 }
  0x97   :  { %1200 = vmatpush1.bf16.msra.mxu0 %v4545_v49  ;;  %1243 = vmatpush1.bf16.msra.mxu1 %v4552_v51 }
  0x98   :  { %1201 = vmatprep.subr.bf16.mxu0 %v4547_v50  ;;  %1244 = vmatprep.subr.bf16.mxu1 %v4558_v54 }
  0x9b   :  { %1202 = vmatpush1.bf16.msra.mxu0 %v4555_v53  ;;  %1245 = vmatpush1.bf16.msra.mxu1 %v4564_v56 }
  0x9c   :  { %1203 = vmatprep.subr.bf16.mxu0 %v4561_v55  ;;  %1246 = vmatprep.subr.bf16.mxu1 %v4566_v57 }
  0x9f   :  { %1204 = vmatpush1.bf16.msra.mxu0 %v4568_v58  ;;  %1247 = vmatpush1.bf16.msra.mxu1 %v4574_v60 }
  0xa0   :  { %1205 = vmatprep.subr.bf16.mxu0 %v4572_v59  ;;  %1248 = vmatprep.subr.bf16.mxu1 %v4583_v63 }
  0xa3   :  { %1206 = vmatpush1.bf16.msra.mxu0 %v4580_v62  ;;  %1249 = vmatpush1.bf16.msra.mxu1 %v4587_v2 }
  0xa4   :  { %1207 = vmatprep.subr.bf16.mxu0 %v4585_v1  ;;  %1250 = vmatprep.subr.bf16.mxu1 %v4590_v3 }
  0xa7   :  { %1208 = vmatpush1.bf16.msra.mxu0 %v4594_v4  ;;  %1251 = vmatpush1.bf16.msra.mxu1 %v4598_v5 }
  0xa8   :  { %1546 = vmatprep.subr.bf16.mxu0 %v4503_v33  ;;  %1589 = vmatprep.subr.bf16.mxu1 %v4505_v34 }
 0x10a   :  { %v4651_v13 = vpop.f32.mrf.mxu0  ;;  %v4653_v14 = vpop.f32.mrf.mxu1 }
 0x10c   :  { %v4655_v15 = vpop.f32.mrf.mxu0  ;;  %v4657_v16 = vpop.f32.mrf.mxu1 }
 0x10e   :  { %v4662_v20 = vpop.f32.mrf.mxu0  ;;  %v4664_v21 = vpop.f32.mrf.mxu1 }
 0x110   :  { %v4666_v24 = vpop.f32.mrf.mxu0  ;;  %v4668_v25 = vpop.f32.mrf.mxu1 }
 0x112   :  { %v390_v28 = vpop.f32.mrf.mxu0  ;;  %v503_v29 = vpop.f32.mrf.mxu1 }
 0x113   :  { %v4679_v32 = vadd.f32 %v390_v28, %v4670_v26  ;;  %v4682_v33 = vadd.f32 %v503_v29, %v4672_v27 }
 0x114   :  { %v392_v34 = vpop.f32.mrf.mxu0  ;;  %v505_v35 = vpop.f32.mrf.mxu1 }
 0x115   :  { %v4685_v43 = vadd.f32 %v392_v34, %v4674_v30  ;;  %v4688_v52 = vadd.f32 %v505_v35, %v4676_v31 }
 0x116   :  { %v394_v61 = vpop.f32.mrf.mxu0  ;;  %v507_v6 = vpop.f32.mrf.mxu1 }
 0x117   :  { %v4691_v7 = vadd.f32 %v394_v61, %v4670_v26  ;;  %v4694_v8 = vadd.f32 %v507_v6, %v4672_v27 }
 0x118   :  { %v396_v9 = vpop.f32.mrf.mxu0  ;;  %v509_v10 = vpop.f32.mrf.mxu1 }
 0x119   :  { %5221 = vst [vmem:[#allocation15_spill] sm:$0xff] %v4694_v8  ;;  %v4697_v11 = vadd.f32 %v396_v9, %v4674_v30  ;;  %v4700_v12 = vadd.f32 %v509_v10, %v4676_v31 }
 0x11a   :  { %v400_v17 = vpop.f32.mrf.mxu0  ;;  %v513_v18 = vpop.f32.mrf.mxu1 }
 0x11b   :  { %v4703_v19 = vadd.f32 %v400_v17, %v4670_v26  ;;  %v4706_v22 = vadd.f32 %v513_v18, %v4672_v27 }
 0x11c   :  { %v402_v23 = vpop.f32.mrf.mxu0  ;;  %v515_v28 = vpop.f32.mrf.mxu1 }
 0x11d   :  { %5222 = vst [vmem:[#allocation16_spill] sm:$0xff] %v4703_v19  ;;  %5223 = vst [vmem:[#allocation17_spill] sm:$0xff] %v4706_v22  ;;  %v4709_v29 = vadd.f32 %v402_v23, %v4674_v30  ;;  %v4712_v34 = vadd.f32 %v515_v28, %v4676_v31 }
 0x11e   :  { %v404_v35 = vpop.f32.mrf.mxu0  ;;  %v517_v61 = vpop.f32.mrf.mxu1 }
 0x11f   :  { %5224 = vst [vmem:[#allocation18_spill] sm:$0xff] %v4709_v29  ;;  %5225 = vst [vmem:[#allocation19_spill] sm:$0xff] %v4712_v34  ;;  %v4715_v6 = vadd.f32 %v404_v35, %v4670_v26  ;;  %v4718_v9 = vadd.f32 %v517_v61, %v4672_v27 }
 0x120   :  { %v406_v10 = vpop.f32.mrf.mxu0  ;;  %v519_v17 = vpop.f32.mrf.mxu1 }
 0x121   :  { %5226 = vst [vmem:[#allocation20_spill] sm:$0xff] %v4715_v6  ;;  %5227 = vst [vmem:[#allocation21_spill] sm:$0xff] %v4718_v9  ;;  %v4721_v18 = vadd.f32 %v406_v10, %v4674_v30  ;;  %v4724_v0 = vadd.f32 %v519_v17, %v4676_v31 }
 0x122   :  { %v410_v23 = vpop.f32.mrf.mxu0  ;;  %v523_v22 = vpop.f32.mrf.mxu1 }
 0x123   :  { %5228 = vst [vmem:[#allocation22_spill] sm:$0xff] %v4721_v18  ;;  %5229 = vst [vmem:[#allocation23_spill] sm:$0xff] %v4724_v0  ;;  %v4727_v28 = vadd.f32 %v410_v23, %v4670_v26  ;;  %v4730_v34 = vadd.f32 %v523_v22, %v4672_v27 }
 0x124   :  { %v412_v35 = vpop.f32.mrf.mxu0  ;;  %v525_v6 = vpop.f32.mrf.mxu1 }
 0x125   :  { %5230 = vst [vmem:[#allocation24_spill] sm:$0xff] %v4727_v28  ;;  %5231 = vst [vmem:[#allocation25_spill] sm:$0xff] %v4730_v34  ;;  %v4733_v61 = vadd.f32 %v412_v35, %v4674_v30  ;;  %v4736_v9 = vadd.f32 %v525_v6, %v4676_v31 }
 0x126   :  { %v414_v10 = vpop.f32.mrf.mxu0  ;;  %v527_v18 = vpop.f32.mrf.mxu1 }
 0x127   :  { %5232 = vst [vmem:[#allocation26_spill] sm:$0xff] %v4733_v61  ;;  %5233 = vst [vmem:[#allocation27_spill] sm:$0xff] %v4736_v9  ;;  %v4739_v17 = vadd.f32 %v414_v10, %v4670_v26  ;;  %v4742_v0 = vadd.f32 %v527_v18, %v4672_v27 }
 0x128   :  { %v416_v23 = vpop.f32.mrf.mxu0  ;;  %v529_v28 = vpop.f32.mrf.mxu1 }
 0x129   :  { %5234 = vst [vmem:[#allocation28_spill] sm:$0xff] %v4739_v17  ;;  %5235 = vst [vmem:[#allocation29_spill] sm:$0xff] %v4742_v0  ;;  %v4745_v22 = vadd.f32 %v416_v23, %v4674_v30  ;;  %v4748_v34 = vadd.f32 %v529_v28, %v4676_v31 }
 0x12a   :  { %v420_v35 = vpop.f32.mrf.mxu0  ;;  %v533_v61 = vpop.f32.mrf.mxu1 }
 0x12b   :  { %5236 = vst [vmem:[#allocation30_spill] sm:$0xff] %v4745_v22  ;;  %5237 = vst [vmem:[#allocation31_spill] sm:$0xff] %v4748_v34  ;;  %v4751_v6 = vadd.f32 %v420_v35, %v4670_v26  ;;  %v4754_v9 = vadd.f32 %v533_v61, %v4672_v27 }
 0x12c   :  { %v422_v10 = vpop.f32.mrf.mxu0  ;;  %v535_v17 = vpop.f32.mrf.mxu1 }
 0x12d   :  { %5238 = vst [vmem:[#allocation32_spill] sm:$0xff] %v4751_v6  ;;  %5239 = vst [vmem:[#allocation33_spill] sm:$0xff] %v4754_v9  ;;  %v4757_v18 = vadd.f32 %v422_v10, %v4674_v30  ;;  %v4760_v0 = vadd.f32 %v535_v17, %v4676_v31 }
 0x12e   :  { %v424_v23 = vpop.f32.mrf.mxu0  ;;  %v537_v22 = vpop.f32.mrf.mxu1 }
 0x12f   :  { %5240 = vst [vmem:[#allocation34_spill] sm:$0xff] %v4757_v18  ;;  %5241 = vst [vmem:[#allocation35_spill] sm:$0xff] %v4760_v0  ;;  %v4763_v28 = vadd.f32 %v424_v23, %v4670_v26  ;;  %v4766_v34 = vadd.f32 %v537_v22, %v4672_v27 }
 0x130   :  { %v426_v35 = vpop.f32.mrf.mxu0  ;;  %v539_v6 = vpop.f32.mrf.mxu1 }
 0x131   :  { %5242 = vst [vmem:[#allocation36_spill] sm:$0xff] %v4763_v28  ;;  %5243 = vst [vmem:[#allocation37_spill] sm:$0xff] %v4766_v34  ;;  %v4769_v61 = vadd.f32 %v426_v35, %v4674_v30  ;;  %v4772_v9 = vadd.f32 %v539_v6, %v4676_v31 }
 0x132   :  { %v430_v10 = vpop.f32.mrf.mxu0  ;;  %v543_v18 = vpop.f32.mrf.mxu1 }
 0x133   :  { %5244 = vst [vmem:[#allocation38_spill] sm:$0xff] %v4769_v61  ;;  %5245 = vst [vmem:[#allocation39_spill] sm:$0xff] %v4772_v9  ;;  %v4775_v17 = vadd.f32 %v430_v10, %v4670_v26  ;;  %v4778_v0 = vadd.f32 %v543_v18, %v4672_v27 }
 0x134   :  { %v432_v23 = vpop.f32.mrf.mxu0  ;;  %v545_v28 = vpop.f32.mrf.mxu1 }
 0x135   :  { %5246 = vst [vmem:[#allocation40_spill] sm:$0xff] %v4775_v17  ;;  %5247 = vst [vmem:[#allocation41_spill] sm:$0xff] %v4778_v0  ;;  %v4781_v22 = vadd.f32 %v432_v23, %v4674_v30  ;;  %v4784_v34 = vadd.f32 %v545_v28, %v4676_v31 }
 0x136   :  { %v434_v35 = vpop.f32.mrf.mxu0  ;;  %v547_v61 = vpop.f32.mrf.mxu1 }
 0x137   :  { %5248 = vst [vmem:[#allocation42_spill] sm:$0xff] %v4781_v22  ;;  %5249 = vst [vmem:[#allocation43_spill] sm:$0xff] %v4784_v34  ;;  %v4787_v6 = vadd.f32 %v434_v35, %v4670_v26  ;;  %v4790_v9 = vadd.f32 %v547_v61, %v4672_v27 }
 0x138   :  { %v436_v10 = vpop.f32.mrf.mxu0  ;;  %v549_v17 = vpop.f32.mrf.mxu1 }
 0x139   :  { %5250 = vst [vmem:[#allocation44_spill] sm:$0xff] %v4787_v6  ;;  %5251 = vst [vmem:[#allocation45_spill] sm:$0xff] %v4790_v9  ;;  %v4793_v18 = vadd.f32 %v436_v10, %v4674_v30  ;;  %v4796_v0 = vadd.f32 %v549_v17, %v4676_v31 }
 0x13a   :  { %v440_v23 = vpop.f32.mrf.mxu0  ;;  %v553_v22 = vpop.f32.mrf.mxu1 }
 0x13b   :  { %5252 = vst [vmem:[#allocation46_spill] sm:$0xff] %v4793_v18  ;;  %5253 = vst [vmem:[#allocation47_spill] sm:$0xff] %v4796_v0  ;;  %v4799_v28 = vadd.f32 %v440_v23, %v4670_v26  ;;  %v4802_v34 = vadd.f32 %v553_v22, %v4672_v27 }
 0x13c   :  { %v442_v35 = vpop.f32.mrf.mxu0  ;;  %v555_v6 = vpop.f32.mrf.mxu1 }
 0x13d   :  { %5254 = vst [vmem:[#allocation48_spill] sm:$0xff] %v4799_v28  ;;  %5255 = vst [vmem:[#allocation49_spill] sm:$0xff] %v4802_v34  ;;  %v4805_v61 = vadd.f32 %v442_v35, %v4674_v30  ;;  %v4808_v9 = vadd.f32 %v555_v6, %v4676_v31 }
 0x13e   :  { %v444_v10 = vpop.f32.mrf.mxu0  ;;  %v557_v18 = vpop.f32.mrf.mxu1 }
 0x13f   :  { %5256 = vst [vmem:[#allocation50_spill] sm:$0xff] %v4805_v61  ;;  %5257 = vst [vmem:[#allocation51_spill] sm:$0xff] %v4808_v9  ;;  %v4811_v17 = vadd.f32 %v444_v10, %v4670_v26  ;;  %v4814_v0 = vadd.f32 %v557_v18, %v4672_v27 }
 0x140   :  { %v446_v23 = vpop.f32.mrf.mxu0  ;;  %v559_v28 = vpop.f32.mrf.mxu1 }
 0x141   :  { %5258 = vst [vmem:[#allocation52_spill] sm:$0xff] %v4811_v17  ;;  %5259 = vst [vmem:[#allocation53_spill] sm:$0xff] %v4814_v0  ;;  %v4817_v22 = vadd.f32 %v446_v23, %v4674_v30  ;;  %v4820_v34 = vadd.f32 %v559_v28, %v4676_v31 }
 0x142   :  { %v450_v35 = vpop.f32.mrf.mxu0  ;;  %v563_v61 = vpop.f32.mrf.mxu1 }
 0x143   :  { %5260 = vst [vmem:[#allocation54_spill] sm:$0xff] %v4817_v22  ;;  %5261 = vst [vmem:[#allocation55_spill] sm:$0xff] %v4820_v34  ;;  %v4823_v6 = vadd.f32 %v450_v35, %v4670_v26  ;;  %v4826_v9 = vadd.f32 %v563_v61, %v4672_v27  ;;  %v381_v61 = vadd.f32 %v4651_v13, %v4670_v26 }
 0x144   :  { %v452_v10 = vpop.f32.mrf.mxu0  ;;  %v565_v17 = vpop.f32.mrf.mxu1  ;;  %v387_v13 = vadd.f32 %v4666_v24, %v4674_v30 }
 0x145   :  { %5262 = vst [vmem:[#allocation56_spill] sm:$0xff] %v4823_v6  ;;  %5263 = vst [vmem:[#allocation57_spill] sm:$0xff] %v4826_v9  ;;  %v4829_v18 = vadd.f32 %v452_v10, %v4674_v30  ;;  %v4832_v0 = vadd.f32 %v565_v17, %v4676_v31 }
 0x146   :  { %v454_v23 = vpop.f32.mrf.mxu0  ;;  %v567_v22 = vpop.f32.mrf.mxu1 }
 0x147   :  { %5264 = vst [vmem:[#allocation58_spill] sm:$0xff] %v4829_v18  ;;  %5265 = vst [vmem:[#allocation59_spill] sm:$0xff] %v4832_v0  ;;  %v4835_v28 = vadd.f32 %v454_v23, %v4670_v26  ;;  %v4838_v34 = vadd.f32 %v567_v22, %v4672_v27  ;;  %v383_v0 = vadd.f32 %v4655_v15, %v4674_v30 }
 0x148   :  { %v456_v35 = vpop.f32.mrf.mxu0  ;;  %v569_v6 = vpop.f32.mrf.mxu1  ;;  %v385_v22 = vadd.f32 %v4662_v20, %v4670_v26  ;;  %v496_v20 = vadd.f32 %v4657_v16, %v4676_v31  ;;  %v494_v26 = vadd.f32 %v4653_v14, %v4672_v27 }
 0x149   :  { %5266 = vst [vmem:[#allocation60_spill] sm:$0xff] %v4835_v28  ;;  %5267 = vst [vmem:[#allocation61_spill] sm:$0xff] %v4838_v34  ;;  %v4843_v9 = vadd.f32 %v456_v35, %v4674_v30  ;;  %v4846_v10 = vadd.f32 %v569_v6, %v4676_v31  ;;  %v500_v30 = vadd.f32 %v4668_v25, %v4676_v31 }
 0x14a   :  { %v875_v17 = vpop.f32.mrf.mxu0  ;;  %v918_v28 = vpop.f32.mrf.mxu1 }
 0x14b   :  { %5268 = vst [vmem:[#allocation62_spill] sm:$0xff] %v4843_v9  ;;  %5269 = vst [vmem:[#allocation63_spill] sm:$0xff] %v4846_v10  ;;  %v927_v23 = vadd.f32 %v875_v17, %v381_v61 }
 0x14c   :  { %v877_v18 = vpop.f32.mrf.mxu0  ;;  %v920_v6 = vpop.f32.mrf.mxu1 }
 0x14d   :  { %v3558_v34 = vmul.f32 -1.442695, %v927_v23  ;;  %v928_v29 = vadd.f32 %v877_v18, %v383_v0  ;;  %v930_v0 = vadd.f32 %v920_v6, %v496_v20 }
 0x14e   :  { %v879_v19 = vpop.f32.mrf.mxu0  ;;  %v922_v61 = vpop.f32.mrf.mxu1 }
 0x14f   :  { %4112 = vpow2.f32 %v3558_v34  ;;  %v3560_v35 = vmul.f32 -1.442695, %v928_v29  ;;  %v931_v10 = vadd.f32 %v879_v19, %v385_v22  ;;  %v929_v19 = vadd.f32 %v918_v28, %v494_v26 }
 0x150   :  { %v881_v9 = vpop.f32.mrf.mxu0  ;;  %v924_v24 = vpop.f32.mrf.mxu1  ;;  %v498_v29 = vadd.f32 %v4664_v21, %v4672_v27  ;;  %v3562_v34 = vmul.f32 -1.442695, %v930_v0 }
 0x151   :  { %4114 = vpow2.f32 %v3560_v35  ;;  %v3559_v8 = vmul.f32 -1.442695, %v931_v10  ;;  %v932_v15 = vadd.f32 %v881_v9, %v387_v13 }
 0x152   :  { %v933_v18 = vadd.f32 %v922_v61, %v498_v29 }
 0x153   :  { %4116 = vpow2.f32 %v3559_v8  ;;  %v3561_v17 = vmul.f32 -1.442695, %v932_v15  ;;  %v934_v8 = vadd.f32 %v924_v24, %v500_v30 }
 0x155   :  { %4118 = vpow2.f32 %v3561_v17  ;;  %v3563_v23 = vmul.f32 -1.442695, %v934_v8 }
 0x156   :  { %4120 = vtanh.f32 %v929_v19 }
 0x157   :  { %4122 = vpow2.f32 %v3562_v34 }
 0x15c   :  { %v4113_v9 = vpop.eup %4112 }
 0x15d   :  { %v941_v10 = vadd.f32 1.0, %v4113_v9 }
 0x15e   :  { %v4115_v16 = vpop.eup %4114 }
 0x15f   :  { %4124 = vrcp.f32 %v941_v10  ;;  %v953_v22 = vadd.f32 1.0, %v4115_v16 }
 0x160   :  { %v4117_v14 = vpop.eup %4116  ;;  %4126 = vtanh.f32 %v933_v18 }
 0x161   :  { %4128 = vrcp.f32 %v953_v22  ;;  %v942_v13 = vadd.f32 1.0, %v4117_v14  ;;  %v5270_v14 = vmov 0  }
 0x162   :  { %v4119_v25 = vpop.eup %4118  ;;  %4130 = vpow2.f32 %v3563_v23 }
 0x163   :  { %4132 = vrcp.f32 %v942_v13  ;;  %v954_v31 = vadd.f32 1.0, %v4119_v25  ;;  %v4121_v21 = vpop.eup %4120 }
 0x164   :  { %v4123_v27 = vpop.eup %4122 }
 0x165   :  { %4134 = vrcp.f32 %v954_v31  ;;  %v967_v0 = vadd.f32 1.0, %v4123_v27 }
 0x167   :  { %4136 = vrcp.f32 %v967_v0 }
 0x16c   :  { %v4125_v28 = vpop.eup %4124 }
 0x16d   :  { %v4127_v35 = vpop.eup %4126  ;;  %v975_v6 = vmul.f32 %v4125_v28, %v4121_v21 }
 0x16e   :  { %v4129_v15 = vpop.eup %4128 }
 0x16f   :  { %v4131_v61 = vpop.eup %4130  ;;  %v973_v17 = vmul.f32 0.0, %v4129_v15 }
 0x170   :  { %v4133_v20 = vpop.eup %4132  ;;  %v968_v19 = vadd.f32 1.0, %v4131_v61 }
 0x171   :  { %v4862_v26 = vadd.f32 %v975_v6, %v973_v17  ;;  %v976_v24 = vmul.f32 %v4133_v20, %v4127_v35 }
 0x172   :  { %v4135_v30 = vpop.eup %4134 }
 0x173   :  { %v974_v29 = vmul.f32 0.0, %v4135_v30  ;;  %4138 = vtanh.f32 %v4862_v26 }
 0x174   :  { %4140 = vrcp.f32 %v968_v19  ;;  %v4137_v8 = vpop.eup %4136 }
 0x175   :  { %v4865_v34 = vadd.f32 %v976_v24, %v974_v29  ;;  %v4918_v29 = vld [vmem:[#allocation10 + $0xe4] ss:$16 sps:$4 sm:$0xff]  }
 0x177   :  { %4142 = vtanh.f32 %v4865_v34 }
 0x180   :  { %v4139_v9 = vpop.eup %4138 }
 0x181   :  { %v4141_v18 = vpop.eup %4140  ;;  %v981_v16 = vmul.f32 %v4139_v9, %v4137_v8  ;;  %v4922_v8 = vld [vmem:[#allocation10 + $0xe0] ss:$16 sps:$4 sm:$0xff]   ;;  %v4924_v9 = vld [vmem:[#allocation10 + $0xe8] ss:$16 sps:$4 sm:$0xff]  }
 0x184   :  { %v4143_v10 = vpop.eup %4142 }
 0x185   :  { %v982_v23 = vmul.f32 %v4143_v10, %v4141_v18  ;;  %v4930_v18 = vld [vmem:[#allocation10 + $0xc4] ss:$16 sps:$4 sm:$0xff]   ;;  %v4932_v10 = vld [vmem:[#allocation10 + $0xcc] ss:$16 sps:$4 sm:$0xff]  }
 0x187   :  { %v983_v22 = vpack.c.bf16 %v982_v23, %v981_v16  ;;  %v4934_v16 = vld [vmem:[#allocation10 + $0xc0] ss:$16 sps:$4 sm:$0xff]   ;;  %v4936_v23 = vld [vmem:[#allocation10 + $0xc8] ss:$16 sps:$4 sm:$0xff]  }
 0x189   :  { %3866 = vst [vmem:[#allocation11] sm:$0xff] %v983_v22   ;;  %1226 = vmatmul.mubr.bf16.vlgmr.msra.gmra.mxu0 %v983_v22  ;;  %1269 = vmatmul.mubr.bf16.vlgmr.msra.gmra.mxu1 %v983_v22  ;;  %v4942_v22 = vld [vmem:[#allocation10 + $0xa4] ss:$16 sps:$4 sm:$0xff]  }
 0x18a   :  { %1547 = vmatpush1.bf16.msra.mxu0 %v4507_v36  ;;  %1590 = vmatpush1.bf16.msra.mxu1 %v4513_v38 }
 0x18b   :  { %1548 = vmatprep.subr.bf16.mxu0 %v4510_v37  ;;  %1591 = vmatprep.subr.bf16.mxu1 %v4515_v39 }
 0x18c   :  { %1578 = vmatprep.mubr.bf16.mxu0 %v5270_v14  ;;  %1621 = vmatprep.mubr.bf16.mxu1 %v5270_v14 }
 0x18e   :  { %1549 = vmatpush1.bf16.msra.mxu0 %v4519_v40  ;;  %1592 = vmatpush1.bf16.msra.mxu1 %v4526_v42 }
 0x18f   :  { %1550 = vmatprep.subr.bf16.mxu0 %v4523_v41  ;;  %1593 = vmatprep.subr.bf16.mxu1 %v4533_v45 }
 0x192   :  { %1551 = vmatpush1.bf16.msra.mxu0 %v4530_v44  ;;  %1594 = vmatpush1.bf16.msra.mxu1 %v4538_v47 }
 0x193   :  { %1552 = vmatprep.subr.bf16.mxu0 %v4535_v46  ;;  %1595 = vmatprep.subr.bf16.mxu1 %v4540_v48 }
 0x196   :  { %1553 = vmatpush1.bf16.msra.mxu0 %v4545_v49  ;;  %1596 = vmatpush1.bf16.msra.mxu1 %v4552_v51 }
 0x197   :  { %1554 = vmatprep.subr.bf16.mxu0 %v4547_v50  ;;  %1597 = vmatprep.subr.bf16.mxu1 %v4558_v54 }
 0x19a   :  { %1555 = vmatpush1.bf16.msra.mxu0 %v4555_v53  ;;  %1598 = vmatpush1.bf16.msra.mxu1 %v4564_v56 }
 0x19b   :  { %1556 = vmatprep.subr.bf16.mxu0 %v4561_v55  ;;  %1599 = vmatprep.subr.bf16.mxu1 %v4566_v57 }
 0x19e   :  { %1557 = vmatpush1.bf16.msra.mxu0 %v4568_v58  ;;  %1600 = vmatpush1.bf16.msra.mxu1 %v4574_v60 }
 0x19f   :  { %1558 = vmatprep.subr.bf16.mxu0 %v4572_v59  ;;  %1601 = vmatprep.subr.bf16.mxu1 %v4583_v63  ;;  %v5271_v59 = vld [vmem:[#allocation15_spill] sm:$0xff] }
 0x1a2   :  { %1559 = vmatpush1.bf16.msra.mxu0 %v4580_v62  ;;  %1602 = vmatpush1.bf16.msra.mxu1 %v4587_v2 }
 0x1a3   :  { %1560 = vmatprep.subr.bf16.mxu0 %v4585_v1  ;;  %1603 = vmatprep.subr.bf16.mxu1 %v4590_v3 }
 0x1a6   :  { %1561 = vmatpush1.bf16.msra.mxu0 %v4594_v4  ;;  %1604 = vmatpush1.bf16.msra.mxu1 %v4598_v5 }
 0x1a7   :  { %1899 = vmatprep.subr.bf16.mxu0 %v4918_v29 }
 0x249   :  { %v1227_v36 = vpop.f32.mrf.mxu0  ;;  %v1270_v38 = vpop.f32.mrf.mxu1 }
 0x24a   :  { %v1279_v37 = vadd.f32 %v1227_v36, %v4679_v32  ;;  %v1281_v55 = vadd.f32 %v1270_v38, %v4682_v33  ;;  %v4944_v36 = vld [vmem:[#allocation10 + $0xac] ss:$16 sps:$4 sm:$0xff]   ;;  %v4948_v38 = vld [vmem:[#allocation10 + $0xa8] ss:$16 sps:$4 sm:$0xff]  }
 0x24b   :  { %v1229_v39 = vpop.f32.mrf.mxu0  ;;  %v1272_v45 = vpop.f32.mrf.mxu1 }
 0x24c   :  { %v3598_v40 = vmul.f32 -1.442695, %v1279_v37  ;;  %v1280_v41 = vadd.f32 %v1229_v39, %v4685_v43  ;;  %v1282_v53 = vadd.f32 %v1272_v45, %v4688_v52  ;;  %v4946_v37 = vld [vmem:[#allocation10 + $0xa0] ss:$16 sps:$4 sm:$0xff]   ;;  %v4965_v45 = vld [vmem:[#allocation10 + $0x6c] ss:$16 sps:$4 sm:$0xff]  }
 0x24d   :  { %v1231_v42 = vpop.f32.mrf.mxu0  ;;  %v1274_v50 = vpop.f32.mrf.mxu1  ;;  %v4954_v39 = vld [vmem:[#allocation10 + $0x80] ss:$16 sps:$4 sm:$0xff]  }
 0x24e   :  { %4144 = vpow2.f32 %v3598_v40  ;;  %v3600_v44 = vmul.f32 -1.442695, %v1280_v41  ;;  %v1283_v46 = vadd.f32 %v1231_v42, %v4691_v7  ;;  %v3602_v56 = vmul.f32 -1.442695, %v1282_v53  ;;  %v4956_v40 = vld [vmem:[#allocation10 + $0x84] ss:$16 sps:$4 sm:$0xff]  }
 0x24f   :  { %v1233_v47 = vpop.f32.mrf.mxu0  ;;  %v1276_v54 = vpop.f32.mrf.mxu1  ;;  %v1285_v60 = vadd.f32 %v1274_v50, %v5271_v59  ;;  %v4958_v41 = vld [vmem:[#allocation10 + $0x88] ss:$16 sps:$4 sm:$0xff]   ;;  %v4960_v42 = vld [vmem:[#allocation10 + $0x8c] ss:$16 sps:$4 sm:$0xff]   ;;  %v4982_v50 = vld [vmem:[#allocation10 + $0x40] ss:$16 sps:$4 sm:$0xff]  }
 0x250   :  { %4146 = vpow2.f32 %v3600_v44  ;;  %v3599_v48 = vmul.f32 -1.442695, %v1283_v46  ;;  %v1284_v49 = vadd.f32 %v1233_v47, %v4697_v11  ;;  %v1286_v57 = vadd.f32 %v1276_v54, %v4700_v12  ;;  %v4962_v44 = vld [vmem:[#allocation10 + $0x64] ss:$16 sps:$4 sm:$0xff]   ;;  %v4970_v46 = vld [vmem:[#allocation10 + $0x60] ss:$16 sps:$4 sm:$0xff]  }
 0x251   :  { %v4972_v47 = vld [vmem:[#allocation10 + $0x68] ss:$16 sps:$4 sm:$0xff]   ;;  %v4988_v53 = vld [vmem:[#allocation10 + $0x24] ss:$16 sps:$4 sm:$0xff]   ;;  %v4990_v54 = vld [vmem:[#allocation10 + $0x2c] ss:$16 sps:$4 sm:$0xff]  }
 0x252   :  { %4148 = vpow2.f32 %v3599_v48  ;;  %v3601_v51 = vmul.f32 -1.442695, %v1284_v49  ;;  %v3603_v1 = vmul.f32 -1.442695, %v1286_v57  ;;  %v4976_v48 = vld [vmem:[#allocation10 + $0x44] ss:$16 sps:$4 sm:$0xff]  }
 0x253   :  { %v4978_v49 = vld [vmem:[#allocation10 + $0x4c] ss:$16 sps:$4 sm:$0xff]   ;;  %v5000_v57 = vld [vmem:[#allocation10 + $0x4] ss:$16 sps:$4 sm:$0xff]   ;;  %v5006_v59 = vld [vmem:[#allocation10] ss:$16 sps:$4 sm:$0xff]  }
 0x254   :  { %4150 = vpow2.f32 %v3601_v51  ;;  %v4984_v51 = vld [vmem:[#allocation10 + $0x48] ss:$16 sps:$4 sm:$0xff]  }
 0x255   :  { %4152 = vtanh.f32 %v1281_v55  ;;  %v4994_v55 = vld [vmem:[#allocation10 + $0x20] ss:$16 sps:$4 sm:$0xff]  }
 0x256   :  { %4154 = vpow2.f32 %v3602_v56  ;;  %v4996_v56 = vld [vmem:[#allocation10 + $0x28] ss:$16 sps:$4 sm:$0xff]  }
 0x25b   :  { %v4145_v58 = vpop.eup %4144 }
 0x25c   :  { %v1293_v62 = vadd.f32 1.0, %v4145_v58  ;;  %v5002_v58 = vld [vmem:[#allocation10 + $0xc] ss:$16 sps:$4 sm:$0xff]  }
 0x25d   :  { %v4147_v63 = vpop.eup %4146 }
 0x25e   :  { %4156 = vrcp.f32 %v1293_v62  ;;  %v1305_v2 = vadd.f32 1.0, %v4147_v63  ;;  %v5272_v63 = vld [vmem:[#allocation16_spill] sm:$0xff] }
 0x25f   :  { %v4149_v3 = vpop.eup %4148  ;;  %4158 = vtanh.f32 %v1285_v60  ;;  %v5008_v60 = vld [vmem:[#allocation10 + $0x8] ss:$16 sps:$4 sm:$0xff]  }
 0x260   :  { %4160 = vrcp.f32 %v1305_v2  ;;  %v1294_v4 = vadd.f32 1.0, %v4149_v3 }
 0x261   :  { %v4151_v5 = vpop.eup %4150  ;;  %4162 = vpow2.f32 %v3603_v1 }
 0x262   :  { %4164 = vrcp.f32 %v1294_v4  ;;  %v1306_v32 = vadd.f32 1.0, %v4151_v5  ;;  %v4153_v33 = vpop.eup %4152  ;;  %v5273_v5 = vld [vmem:[#allocation18_spill] sm:$0xff] }
 0x263   :  { %v4155_v43 = vpop.eup %4154 }
 0x264   :  { %4166 = vrcp.f32 %v1306_v32  ;;  %v1319_v21 = vadd.f32 1.0, %v4155_v43 }
 0x266   :  { %4168 = vrcp.f32 %v1319_v21 }
 0x26b   :  { %v4157_v52 = vpop.eup %4156 }
 0x26c   :  { %v4159_v7 = vpop.eup %4158  ;;  %v1327_v11 = vmul.f32 %v4157_v52, %v4153_v33 }
 0x26d   :  { %v4161_v12 = vpop.eup %4160 }
 0x26e   :  { %v4163_v13 = vpop.eup %4162  ;;  %v1325_v25 = vmul.f32 %v4161_v12, %v4862_v26 }
 0x26f   :  { %v4165_v31 = vpop.eup %4164  ;;  %v1320_v6 = vadd.f32 1.0, %v4163_v13 }
 0x270   :  { %v4909_v27 = vadd.f32 %v1327_v11, %v1325_v25  ;;  %v1328_v28 = vmul.f32 %v4165_v31, %v4159_v7  ;;  %v5274_v7 = vld [vmem:[#allocation20_spill] sm:$0xff]  ;;  %v5275_v25 = vld [vmem:[#allocation22_spill] sm:$0xff] }
 0x271   :  { %v4167_v35 = vpop.eup %4166 }
 0x272   :  { %v1326_v15 = vmul.f32 %v4167_v35, %v4865_v34  ;;  %4170 = vtanh.f32 %v4909_v27  ;;  %v4920_v34 = vld [vmem:[#allocation10 + $0xec] ss:$16 sps:$4 sm:$0xff]   ;;  %v5276_v35 = vld [vmem:[#allocation19_spill] sm:$0xff] }
 0x273   :  { %4172 = vrcp.f32 %v1320_v6  ;;  %v4169_v17 = vpop.eup %4168  ;;  %1942 = vmatprep.subr.bf16.mxu1 %v4920_v34 }
 0x274   :  { %v4912_v61 = vadd.f32 %v1328_v28, %v1326_v15 }
 0x276   :  { %4174 = vtanh.f32 %v4912_v61 }
 0x27f   :  { %v4171_v20 = vpop.eup %4170 }
 0x280   :  { %v4173_v0 = vpop.eup %4172  ;;  %v1333_v24 = vmul.f32 %v4171_v20, %v4169_v17  ;;  %v5277_v17 = vld [vmem:[#allocation17_spill] sm:$0xff] }
 0x283   :  { %v4175_v26 = vpop.eup %4174 }
 0x284   :  { %v1334_v30 = vmul.f32 %v4175_v26, %v4173_v0  ;;  %v5278_v26 = vld [vmem:[#allocation23_spill] sm:$0xff] }
 0x286   :  { %v1335_v19 = vpack.c.bf16 %v1334_v30, %v1333_v24 }
 0x288   :  { %3871 = vst [vmem:[#allocation11 + $0x8] sm:$0xff] %v1335_v19   ;;  %1579 = vmatmul.mubr.bf16.vlgmr.msra.gmra.mxu0 %v1335_v19  ;;  %1622 = vmatmul.mubr.bf16.vlgmr.msra.gmra.mxu1 %v1335_v19  ;;  %v5279_v19 = vld [vmem:[#allocation21_spill] sm:$0xff] }
 0x289   :  { %1931 = vmatprep.mubr.bf16.mxu0 %v5270_v14  ;;  %1974 = vmatprep.mubr.bf16.mxu1 %v5270_v14 }
 0x28a   :  { %1900 = vmatpush1.bf16.msra.mxu0 %v4922_v8  ;;  %1943 = vmatpush1.bf16.msra.mxu1 %v4924_v9 }
 0x28b   :  { %1901 = vmatprep.subr.bf16.mxu0 %v4930_v18  ;;  %1944 = vmatprep.subr.bf16.mxu1 %v4932_v10 }
 0x28e   :  { %1902 = vmatpush1.bf16.msra.mxu0 %v4934_v16  ;;  %1945 = vmatpush1.bf16.msra.mxu1 %v4936_v23 }
 0x28f   :  { %1903 = vmatprep.subr.bf16.mxu0 %v4942_v22  ;;  %1946 = vmatprep.subr.bf16.mxu1 %v4944_v36 }
 0x292   :  { %1904 = vmatpush1.bf16.msra.mxu0 %v4946_v37  ;;  %1947 = vmatpush1.bf16.msra.mxu1 %v4948_v38 }
 0x293   :  { %1905 = vmatprep.subr.bf16.mxu0 %v4956_v40  ;;  %1948 = vmatprep.subr.bf16.mxu1 %v4960_v42 }
 0x296   :  { %1906 = vmatpush1.bf16.msra.mxu0 %v4954_v39  ;;  %1949 = vmatpush1.bf16.msra.mxu1 %v4958_v41 }
 0x297   :  { %1907 = vmatprep.subr.bf16.mxu0 %v4962_v44  ;;  %1950 = vmatprep.subr.bf16.mxu1 %v4965_v45 }
 0x29a   :  { %1908 = vmatpush1.bf16.msra.mxu0 %v4970_v46  ;;  %1951 = vmatpush1.bf16.msra.mxu1 %v4972_v47 }
 0x29b   :  { %1909 = vmatprep.subr.bf16.mxu0 %v4976_v48  ;;  %1952 = vmatprep.subr.bf16.mxu1 %v4978_v49 }
 0x29e   :  { %1910 = vmatpush1.bf16.msra.mxu0 %v4982_v50  ;;  %1953 = vmatpush1.bf16.msra.mxu1 %v4984_v51 }
 0x29f   :  { %1911 = vmatprep.subr.bf16.mxu0 %v4988_v53  ;;  %1954 = vmatprep.subr.bf16.mxu1 %v4990_v54 }
 0x2a2   :  { %1912 = vmatpush1.bf16.msra.mxu0 %v4994_v55  ;;  %1955 = vmatpush1.bf16.msra.mxu1 %v4996_v56 }
 0x2a3   :  { %1913 = vmatprep.subr.bf16.mxu0 %v5000_v57  ;;  %1956 = vmatprep.subr.bf16.mxu1 %v5002_v58 }
 0x2a6   :  { %1914 = vmatpush1.bf16.msra.mxu0 %v5006_v59  ;;  %1957 = vmatpush1.bf16.msra.mxu1 %v5008_v60 }
 0x2a7   :  { %2252 = vmatprep.subr.bf16.mxu0 %v4918_v29  ;;  %2295 = vmatprep.subr.bf16.mxu1 %v4920_v34 }
 0x348   :  { %v1580_v62 = vpop.f32.mrf.mxu0  ;;  %v1623_v2 = vpop.f32.mrf.mxu1 }
 0x349   :  { %v1632_v1 = vadd.f32 %v1580_v62, %v5272_v63  ;;  %v1634_v20 = vadd.f32 %v1623_v2, %v5277_v17 }
 0x34a   :  { %v1582_v3 = vpop.f32.mrf.mxu0  ;;  %v1625_v52 = vpop.f32.mrf.mxu1 }
 0x34b   :  { %v3638_v4 = vmul.f32 -1.442695, %v1632_v1  ;;  %v1633_v32 = vadd.f32 %v1582_v3, %v5273_v5  ;;  %v1635_v6 = vadd.f32 %v1625_v52, %v5276_v35 }
 0x34c   :  { %v1584_v33 = vpop.f32.mrf.mxu0  ;;  %v1627_v21 = vpop.f32.mrf.mxu1 }
 0x34d   :  { %4176 = vpow2.f32 %v3638_v4  ;;  %v3640_v43 = vmul.f32 -1.442695, %v1633_v32  ;;  %v1636_v11 = vadd.f32 %v1584_v33, %v5274_v7  ;;  %v3642_v0 = vmul.f32 -1.442695, %v1635_v6 }
 0x34e   :  { %v1586_v12 = vpop.f32.mrf.mxu0  ;;  %v1629_v15 = vpop.f32.mrf.mxu1  ;;  %v1638_v62 = vadd.f32 %v1627_v21, %v5279_v19 }
 0x34f   :  { %4178 = vpow2.f32 %v3640_v43  ;;  %v3639_v13 = vmul.f32 -1.442695, %v1636_v11  ;;  %v1637_v31 = vadd.f32 %v1586_v12, %v5275_v25  ;;  %v1639_v24 = vadd.f32 %v1629_v15, %v5278_v26 }
 0x351   :  { %4180 = vpow2.f32 %v3639_v13  ;;  %v3641_v28 = vmul.f32 -1.442695, %v1637_v31  ;;  %v3643_v3 = vmul.f32 -1.442695, %v1639_v24 }
 0x353   :  { %4182 = vpow2.f32 %v3641_v28 }
 0x354   :  { %4184 = vtanh.f32 %v1634_v20 }
 0x355   :  { %4186 = vpow2.f32 %v3642_v0 }
 0x35a   :  { %v4177_v30 = vpop.eup %4176 }
 0x35b   :  { %v1646_v63 = vadd.f32 1.0, %v4177_v30 }
 0x35c   :  { %v4179_v1 = vpop.eup %4178 }
 0x35d   :  { %4188 = vrcp.f32 %v1646_v63  ;;  %v1658_v4 = vadd.f32 1.0, %v4179_v1  ;;  %v5280_v1 = vld [vmem:[#allocation24_spill] sm:$0xff] }
 0x35e   :  { %v4181_v5 = vpop.eup %4180  ;;  %4190 = vtanh.f32 %v1638_v62 }
 0x35f   :  { %4192 = vrcp.f32 %v1658_v4  ;;  %v1647_v32 = vadd.f32 1.0, %v4181_v5 }
 0x360   :  { %v4183_v33 = vpop.eup %4182  ;;  %4194 = vpow2.f32 %v3643_v3 }
 0x361   :  { %4196 = vrcp.f32 %v1647_v32  ;;  %v1659_v2 = vadd.f32 1.0, %v4183_v33  ;;  %v4185_v43 = vpop.eup %4184  ;;  %v5281_v33 = vld [vmem:[#allocation26_spill] sm:$0xff] }
 0x362   :  { %v4187_v52 = vpop.eup %4186 }
 0x363   :  { %4198 = vrcp.f32 %v1659_v2  ;;  %v1672_v28 = vadd.f32 1.0, %v4187_v52 }
 0x365   :  { %4200 = vrcp.f32 %v1672_v28 }
 0x36a   :  { %v4189_v7 = vpop.eup %4188 }
 0x36b   :  { %v4191_v11 = vpop.eup %4190  ;;  %v1680_v12 = vmul.f32 %v4189_v7, %v4185_v43 }
 0x36c   :  { %v4193_v13 = vpop.eup %4192 }
 0x36d   :  { %v4195_v25 = vpop.eup %4194  ;;  %v1678_v31 = vmul.f32 %v4193_v13, %v4909_v27 }
 0x36e   :  { %v4197_v21 = vpop.eup %4196  ;;  %v1673_v17 = vadd.f32 1.0, %v4195_v25 }
 0x36f   :  { %v5025_v35 = vadd.f32 %v1680_v12, %v1678_v31  ;;  %v1681_v6 = vmul.f32 %v4197_v21, %v4191_v11  ;;  %v5282_v11 = vld [vmem:[#allocation28_spill] sm:$0xff]  ;;  %v5283_v31 = vld [vmem:[#allocation30_spill] sm:$0xff] }
 0x370   :  { %v4199_v15 = vpop.eup %4198 }
 0x371   :  { %v1679_v20 = vmul.f32 %v4199_v15, %v4912_v61  ;;  %4202 = vtanh.f32 %v5025_v35  ;;  %v5284_v15 = vld [vmem:[#allocation27_spill] sm:$0xff] }
 0x372   :  { %4204 = vrcp.f32 %v1673_v17  ;;  %v4201_v26 = vpop.eup %4200 }
 0x373   :  { %v5028_v0 = vadd.f32 %v1681_v6, %v1679_v20 }
 0x375   :  { %4206 = vtanh.f32 %v5028_v0 }
 0x37e   :  { %v4203_v24 = vpop.eup %4202 }
 0x37f   :  { %v4205_v27 = vpop.eup %4204  ;;  %v1686_v19 = vmul.f32 %v4203_v24, %v4201_v26  ;;  %v5285_v26 = vld [vmem:[#allocation25_spill] sm:$0xff] }
 0x382   :  { %v4207_v30 = vpop.eup %4206 }
 0x383   :  { %v1687_v62 = vmul.f32 %v4207_v30, %v4205_v27  ;;  %v5286_v30 = vld [vmem:[#allocation31_spill] sm:$0xff] }
 0x385   :  { %v1688_v63 = vpack.c.bf16 %v1687_v62, %v1686_v19 }
 0x387   :  { %3876 = vst [vmem:[#allocation11 + $0x10] sm:$0xff] %v1688_v63   ;;  %1932 = vmatmul.mubr.bf16.vlgmr.msra.gmra.mxu0 %v1688_v63  ;;  %1975 = vmatmul.mubr.bf16.vlgmr.msra.gmra.mxu1 %v1688_v63  ;;  %v5287_v63 = vld [vmem:[#allocation29_spill] sm:$0xff] }
 0x388   :  { %2253 = vmatpush1.bf16.msra.mxu0 %v4922_v8  ;;  %2296 = vmatpush1.bf16.msra.mxu1 %v4924_v9 }
 0x389   :  { %2254 = vmatprep.subr.bf16.mxu0 %v4930_v18  ;;  %2297 = vmatprep.subr.bf16.mxu1 %v4932_v10 }
 0x38a   :  { %2284 = vmatprep.mubr.bf16.mxu0 %v5270_v14  ;;  %2327 = vmatprep.mubr.bf16.mxu1 %v5270_v14 }
 0x38c   :  { %2255 = vmatpush1.bf16.msra.mxu0 %v4934_v16  ;;  %2298 = vmatpush1.bf16.msra.mxu1 %v4936_v23 }
 0x38d   :  { %2256 = vmatprep.subr.bf16.mxu0 %v4942_v22  ;;  %2299 = vmatprep.subr.bf16.mxu1 %v4944_v36 }
 0x390   :  { %2257 = vmatpush1.bf16.msra.mxu0 %v4946_v37  ;;  %2300 = vmatpush1.bf16.msra.mxu1 %v4948_v38 }
 0x391   :  { %2258 = vmatprep.subr.bf16.mxu0 %v4956_v40  ;;  %2301 = vmatprep.subr.bf16.mxu1 %v4960_v42 }
 0x394   :  { %2259 = vmatpush1.bf16.msra.mxu0 %v4954_v39  ;;  %2302 = vmatpush1.bf16.msra.mxu1 %v4958_v41 }
 0x395   :  { %2260 = vmatprep.subr.bf16.mxu0 %v4962_v44  ;;  %2303 = vmatprep.subr.bf16.mxu1 %v4965_v45 }
 0x398   :  { %2261 = vmatpush1.bf16.msra.mxu0 %v4970_v46  ;;  %2304 = vmatpush1.bf16.msra.mxu1 %v4972_v47 }
 0x399   :  { %2262 = vmatprep.subr.bf16.mxu0 %v4976_v48  ;;  %2305 = vmatprep.subr.bf16.mxu1 %v4978_v49 }
 0x39c   :  { %2263 = vmatpush1.bf16.msra.mxu0 %v4982_v50  ;;  %2306 = vmatpush1.bf16.msra.mxu1 %v4984_v51 }
 0x39d   :  { %2264 = vmatprep.subr.bf16.mxu0 %v4988_v53  ;;  %2307 = vmatprep.subr.bf16.mxu1 %v4990_v54 }
 0x3a0   :  { %2265 = vmatpush1.bf16.msra.mxu0 %v4994_v55  ;;  %2308 = vmatpush1.bf16.msra.mxu1 %v4996_v56 }
 0x3a1   :  { %2266 = vmatprep.subr.bf16.mxu0 %v5000_v57  ;;  %2309 = vmatprep.subr.bf16.mxu1 %v5002_v58 }
 0x3a4   :  { %2267 = vmatpush1.bf16.msra.mxu0 %v5006_v59  ;;  %2310 = vmatpush1.bf16.msra.mxu1 %v5008_v60 }
 0x3a5   :  { %2605 = vmatprep.subr.bf16.mxu0 %v4918_v29  ;;  %2648 = vmatprep.subr.bf16.mxu1 %v4920_v34 }
 0x447   :  { %v1933_v61 = vpop.f32.mrf.mxu0  ;;  %v1976_v4 = vpop.f32.mrf.mxu1 }
 0x448   :  { %v1985_v3 = vadd.f32 %v1933_v61, %v5280_v1  ;;  %v1987_v24 = vadd.f32 %v1976_v4, %v5285_v26 }
 0x449   :  { %v1935_v5 = vpop.f32.mrf.mxu0  ;;  %v1978_v7 = vpop.f32.mrf.mxu1 }
 0x44a   :  { %v3678_v32 = vmul.f32 -1.442695, %v1985_v3  ;;  %v1986_v2 = vadd.f32 %v1935_v5, %v5281_v33  ;;  %v1988_v17 = vadd.f32 %v1978_v7, %v5284_v15 }
 0x44b   :  { %v1937_v43 = vpop.f32.mrf.mxu0  ;;  %v1980_v28 = vpop.f32.mrf.mxu1 }
 0x44c   :  { %4208 = vpow2.f32 %v3678_v32  ;;  %v3680_v52 = vmul.f32 -1.442695, %v1986_v2  ;;  %v1989_v12 = vadd.f32 %v1937_v43, %v5282_v11  ;;  %v3682_v27 = vmul.f32 -1.442695, %v1988_v17 }
 0x44d   :  { %v1939_v13 = vpop.f32.mrf.mxu0  ;;  %v1982_v20 = vpop.f32.mrf.mxu1  ;;  %v1991_v61 = vadd.f32 %v1980_v28, %v5287_v63 }
 0x44e   :  { %4210 = vpow2.f32 %v3680_v52  ;;  %v3679_v25 = vmul.f32 -1.442695, %v1989_v12  ;;  %v1990_v21 = vadd.f32 %v1939_v13, %v5283_v31  ;;  %v1992_v19 = vadd.f32 %v1982_v20, %v5286_v30 }
 0x450   :  { %4212 = vpow2.f32 %v3679_v25  ;;  %v3681_v6 = vmul.f32 -1.442695, %v1990_v21  ;;  %v3683_v5 = vmul.f32 -1.442695, %v1992_v19 }
 0x452   :  { %4214 = vpow2.f32 %v3681_v6 }
 0x453   :  { %4216 = vtanh.f32 %v1987_v24 }
 0x454   :  { %4218 = vpow2.f32 %v3682_v27 }
 0x459   :  { %v4209_v62 = vpop.eup %4208 }
 0x45a   :  { %v1999_v1 = vadd.f32 1.0, %v4209_v62 }
 0x45b   :  { %v4211_v3 = vpop.eup %4210 }
 0x45c   :  { %4220 = vrcp.f32 %v1999_v1  ;;  %v2011_v32 = vadd.f32 1.0, %v4211_v3  ;;  %v5288_v3 = vld [vmem:[#allocation32_spill] sm:$0xff] }
 0x45d   :  { %v4213_v33 = vpop.eup %4212  ;;  %4222 = vtanh.f32 %v1991_v61 }
 0x45e   :  { %4224 = vrcp.f32 %v2011_v32  ;;  %v2000_v2 = vadd.f32 1.0, %v4213_v33 }
 0x45f   :  { %v4215_v43 = vpop.eup %4214  ;;  %4226 = vpow2.f32 %v3683_v5 }
 0x460   :  { %4228 = vrcp.f32 %v2000_v2  ;;  %v2012_v4 = vadd.f32 1.0, %v4215_v43  ;;  %v4217_v52 = vpop.eup %4216  ;;  %v5289_v43 = vld [vmem:[#allocation34_spill] sm:$0xff] }
 0x461   :  { %v4219_v7 = vpop.eup %4218 }
 0x462   :  { %4230 = vrcp.f32 %v2012_v4  ;;  %v2025_v6 = vadd.f32 1.0, %v4219_v7 }
 0x464   :  { %4232 = vrcp.f32 %v2025_v6  ;;  %v5292_v6 = vld [vmem:[#allocation35_spill] sm:$0xff] }
 0x469   :  { %v4221_v11 = vpop.eup %4220 }
 0x46a   :  { %v4223_v12 = vpop.eup %4222  ;;  %v2033_v13 = vmul.f32 %v4221_v11, %v4217_v52 }
 0x46b   :  { %v4225_v25 = vpop.eup %4224 }
 0x46c   :  { %v4227_v31 = vpop.eup %4226  ;;  %v2031_v21 = vmul.f32 %v4225_v25, %v5025_v35 }
 0x46d   :  { %v4229_v28 = vpop.eup %4228  ;;  %v2026_v26 = vadd.f32 1.0, %v4227_v31 }
 0x46e   :  { %v5075_v15 = vadd.f32 %v2033_v13, %v2031_v21  ;;  %v2034_v17 = vmul.f32 %v4229_v28, %v4223_v12  ;;  %v5290_v12 = vld [vmem:[#allocation36_spill] sm:$0xff] }
 0x46f   :  { %v4231_v20 = vpop.eup %4230 }
 0x470   :  { %v2032_v24 = vmul.f32 %v4231_v20, %v5028_v0  ;;  %4234 = vtanh.f32 %v5075_v15 }
 0x471   :  { %4236 = vrcp.f32 %v2026_v26  ;;  %v4233_v30 = vpop.eup %4232  ;;  %v5293_v26 = vld [vmem:[#allocation33_spill] sm:$0xff] }
 0x472   :  { %v5078_v27 = vadd.f32 %v2034_v17, %v2032_v24 }
 0x474   :  { %4238 = vtanh.f32 %v5078_v27 }
 0x47d   :  { %v4235_v19 = vpop.eup %4234 }
 0x47e   :  { %v4237_v35 = vpop.eup %4236  ;;  %v2039_v63 = vmul.f32 %v4235_v19, %v4233_v30  ;;  %v5294_v19 = vld [vmem:[#allocation39_spill] sm:$0xff] }
 0x481   :  { %v4239_v62 = vpop.eup %4238 }
 0x482   :  { %v2040_v61 = vmul.f32 %v4239_v62, %v4237_v35 }
 0x484   :  { %v2041_v1 = vpack.c.bf16 %v2040_v61, %v2039_v63  ;;  %v5295_v63 = vld [vmem:[#allocation37_spill] sm:$0xff] }
 0x486   :  { %3881 = vst [vmem:[#allocation11 + $0x18] sm:$0xff] %v2041_v1   ;;  %2285 = vmatmul.mubr.bf16.vlgmr.msra.gmra.mxu0 %v2041_v1  ;;  %2328 = vmatmul.mubr.bf16.vlgmr.msra.gmra.mxu1 %v2041_v1 }
 0x487   :  { %2606 = vmatpush1.bf16.msra.mxu0 %v4922_v8  ;;  %2649 = vmatpush1.bf16.msra.mxu1 %v4924_v9 }
 0x488   :  { %2607 = vmatprep.subr.bf16.mxu0 %v4930_v18  ;;  %2650 = vmatprep.subr.bf16.mxu1 %v4932_v10 }
 0x489   :  { %2637 = vmatprep.mubr.bf16.mxu0 %v5270_v14  ;;  %2680 = vmatprep.mubr.bf16.mxu1 %v5270_v14 }
 0x48b   :  { %2608 = vmatpush1.bf16.msra.mxu0 %v4934_v16  ;;  %2651 = vmatpush1.bf16.msra.mxu1 %v4936_v23 }
 0x48c   :  { %2609 = vmatprep.subr.bf16.mxu0 %v4942_v22  ;;  %2652 = vmatprep.subr.bf16.mxu1 %v4944_v36 }
 0x48f   :  { %2610 = vmatpush1.bf16.msra.mxu0 %v4946_v37  ;;  %2653 = vmatpush1.bf16.msra.mxu1 %v4948_v38 }
 0x490   :  { %2611 = vmatprep.subr.bf16.mxu0 %v4956_v40  ;;  %2654 = vmatprep.subr.bf16.mxu1 %v4960_v42 }
 0x493   :  { %2612 = vmatpush1.bf16.msra.mxu0 %v4954_v39  ;;  %2655 = vmatpush1.bf16.msra.mxu1 %v4958_v41 }
 0x494   :  { %2613 = vmatprep.subr.bf16.mxu0 %v4962_v44  ;;  %2656 = vmatprep.subr.bf16.mxu1 %v4965_v45 }
 0x497   :  { %2614 = vmatpush1.bf16.msra.mxu0 %v4970_v46  ;;  %2657 = vmatpush1.bf16.msra.mxu1 %v4972_v47 }
 0x498   :  { %2615 = vmatprep.subr.bf16.mxu0 %v4976_v48  ;;  %2658 = vmatprep.subr.bf16.mxu1 %v4978_v49 }
 0x49b   :  { %2616 = vmatpush1.bf16.msra.mxu0 %v4982_v50  ;;  %2659 = vmatpush1.bf16.msra.mxu1 %v4984_v51 }
 0x49c   :  { %2617 = vmatprep.subr.bf16.mxu0 %v4988_v53  ;;  %2660 = vmatprep.subr.bf16.mxu1 %v4990_v54 }
 0x49f   :  { %2618 = vmatpush1.bf16.msra.mxu0 %v4994_v55  ;;  %2661 = vmatpush1.bf16.msra.mxu1 %v4996_v56 }
 0x4a0   :  { %2619 = vmatprep.subr.bf16.mxu0 %v5000_v57  ;;  %2662 = vmatprep.subr.bf16.mxu1 %v5002_v58 }
 0x4a3   :  { %2620 = vmatpush1.bf16.msra.mxu0 %v5006_v59  ;;  %2663 = vmatpush1.bf16.msra.mxu1 %v5008_v60 }
 0x4a4   :  { %2958 = vmatprep.subr.bf16.mxu0 %v4918_v29  ;;  %3001 = vmatprep.subr.bf16.mxu1 %v4920_v34  ;;  %v5291_v29 = vld [vmem:[#allocation38_spill] sm:$0xff] }
 0x546   :  { %v2286_v0 = vpop.f32.mrf.mxu0  ;;  %v2329_v32 = vpop.f32.mrf.mxu1 }
 0x547   :  { %v2338_v5 = vadd.f32 %v2286_v0, %v5288_v3  ;;  %v2340_v24 = vadd.f32 %v2329_v32, %v5293_v26 }
 0x548   :  { %v2288_v33 = vpop.f32.mrf.mxu0  ;;  %v2331_v11 = vpop.f32.mrf.mxu1 }
 0x549   :  { %v3718_v2 = vmul.f32 -1.442695, %v2338_v5  ;;  %v2339_v4 = vadd.f32 %v2288_v33, %v5289_v43  ;;  %v2341_v17 = vadd.f32 %v2331_v11, %v5292_v6 }
 0x54a   :  { %v2290_v52 = vpop.f32.mrf.mxu0  ;;  %v2333_v34 = vpop.f32.mrf.mxu1 }
 0x54b   :  { %4240 = vpow2.f32 %v3718_v2  ;;  %v3720_v7 = vmul.f32 -1.442695, %v2339_v4  ;;  %v2342_v13 = vadd.f32 %v2290_v52, %v5290_v12  ;;  %v3722_v30 = vmul.f32 -1.442695, %v2341_v17 }
 0x54c   :  { %v2292_v25 = vpop.f32.mrf.mxu0  ;;  %v2335_v20 = vpop.f32.mrf.mxu1  ;;  %v2344_v61 = vadd.f32 %v2333_v34, %v5295_v63 }
 0x54d   :  { %4242 = vpow2.f32 %v3720_v7  ;;  %v3719_v31 = vmul.f32 -1.442695, %v2342_v13  ;;  %v2343_v21 = vadd.f32 %v2292_v25, %v5291_v29  ;;  %v2345_v35 = vadd.f32 %v2335_v20, %v5294_v19 }
 0x54f   :  { %4244 = vpow2.f32 %v3719_v31  ;;  %v3721_v28 = vmul.f32 -1.442695, %v2343_v21  ;;  %v3723_v3 = vmul.f32 -1.442695, %v2345_v35 }
 0x551   :  { %4246 = vpow2.f32 %v3721_v28 }
 0x552   :  { %4248 = vtanh.f32 %v2340_v24 }
 0x553   :  { %4250 = vpow2.f32 %v3722_v30 }
 0x558   :  { %v4241_v62 = vpop.eup %4240 }
 0x559   :  { %v2352_v1 = vadd.f32 1.0, %v4241_v62 }
 0x55a   :  { %v4243_v0 = vpop.eup %4242 }
 0x55b   :  { %4252 = vrcp.f32 %v2352_v1  ;;  %v2364_v5 = vadd.f32 1.0, %v4243_v0 }
 0x55c   :  { %v4245_v33 = vpop.eup %4244  ;;  %4254 = vtanh.f32 %v2344_v61 }
 0x55d   :  { %4256 = vrcp.f32 %v2364_v5  ;;  %v2353_v2 = vadd.f32 1.0, %v4245_v33 }
 0x55e   :  { %v4247_v43 = vpop.eup %4246  ;;  %4258 = vpow2.f32 %v3723_v3 }
 0x55f   :  { %4260 = vrcp.f32 %v2353_v2  ;;  %v2365_v32 = vadd.f32 1.0, %v4247_v43  ;;  %v4249_v4 = vpop.eup %4248 }
 0x560   :  { %v4251_v52 = vpop.eup %4250 }
 0x561   :  { %4262 = vrcp.f32 %v2365_v32  ;;  %v2378_v21 = vadd.f32 1.0, %v4251_v52 }
 0x563   :  { %4264 = vrcp.f32 %v2378_v21 }
 0x568   :  { %v4253_v7 = vpop.eup %4252 }
 0x569   :  { %v4255_v11 = vpop.eup %4254  ;;  %v2386_v12 = vmul.f32 %v4253_v7, %v4249_v4 }
 0x56a   :  { %v4257_v13 = vpop.eup %4256 }
 0x56b   :  { %v4259_v25 = vpop.eup %4258  ;;  %v2384_v31 = vmul.f32 %v4257_v13, %v5075_v15 }
 0x56c   :  { %v4261_v29 = vpop.eup %4260  ;;  %v2379_v17 = vadd.f32 1.0, %v4259_v25 }
 0x56d   :  { %v5125_v34 = vadd.f32 %v2386_v12, %v2384_v31  ;;  %v2387_v28 = vmul.f32 %v4261_v29, %v4255_v11 }
 0x56e   :  { %v4263_v6 = vpop.eup %4262 }
 0x56f   :  { %v2385_v20 = vmul.f32 %v4263_v6, %v5078_v27  ;;  %4266 = vtanh.f32 %v5125_v34 }
 0x570   :  { %4268 = vrcp.f32 %v2379_v17  ;;  %v4265_v24 = vpop.eup %4264 }
 0x571   :  { %v5128_v26 = vadd.f32 %v2387_v28, %v2385_v20 }
 0x573   :  { %4270 = vtanh.f32 %v5128_v26 }
 0x57c   :  { %v4267_v30 = vpop.eup %4266 }
 0x57d   :  { %v4269_v15 = vpop.eup %4268  ;;  %v2392_v35 = vmul.f32 %v4267_v30, %v4265_v24 }
 0x580   :  { %v4271_v19 = vpop.eup %4270 }
 0x581   :  { %v2393_v62 = vmul.f32 %v4271_v19, %v4269_v15 }
 0x583   :  { %v2394_v63 = vpack.c.bf16 %v2393_v62, %v2392_v35 }
 0x585   :  { %3886 = vst [vmem:[#allocation11 + $0x20] sm:$0xff] %v2394_v63   ;;  %2638 = vmatmul.mubr.bf16.vlgmr.msra.gmra.mxu0 %v2394_v63  ;;  %2681 = vmatmul.mubr.bf16.vlgmr.msra.gmra.mxu1 %v2394_v63  ;;  %v4069_v63 = vld [vmem:[#allocation10 + $0xec] ss:$16 sps:$4 sm:$0xff]  }
 0x586   :  { %2959 = vmatpush1.bf16.msra.mxu0 %v4922_v8  ;;  %3002 = vmatpush1.bf16.msra.mxu1 %v4924_v9  ;;  %v5296_v9 = vld [vmem:[#allocation40_spill] sm:$0xff] }
 0x587   :  { %2960 = vmatprep.subr.bf16.mxu0 %v4930_v18  ;;  %3003 = vmatprep.subr.bf16.mxu1 %v4932_v10 }
 0x588   :  { %2990 = vmatprep.mubr.bf16.mxu0 %v5270_v14  ;;  %3033 = vmatprep.mubr.bf16.mxu1 %v5270_v14 }
 0x58a   :  { %2961 = vmatpush1.bf16.msra.mxu0 %v4934_v16  ;;  %3004 = vmatpush1.bf16.msra.mxu1 %v4936_v23 }
 0x58b   :  { %2962 = vmatprep.subr.bf16.mxu0 %v4942_v22  ;;  %3005 = vmatprep.subr.bf16.mxu1 %v4944_v36  ;;  %v5297_v22 = vld [vmem:[#allocation42_spill] sm:$0xff] }
 0x58e   :  { %2963 = vmatpush1.bf16.msra.mxu0 %v4946_v37  ;;  %3006 = vmatpush1.bf16.msra.mxu1 %v4948_v38 }
 0x58f   :  { %2964 = vmatprep.subr.bf16.mxu0 %v4956_v40  ;;  %3007 = vmatprep.subr.bf16.mxu1 %v4960_v42  ;;  %v5298_v40 = vld [vmem:[#allocation44_spill] sm:$0xff] }
 0x592   :  { %2965 = vmatpush1.bf16.msra.mxu0 %v4954_v39  ;;  %3008 = vmatpush1.bf16.msra.mxu1 %v4958_v41 }
 0x593   :  { %2966 = vmatprep.subr.bf16.mxu0 %v4962_v44  ;;  %3009 = vmatprep.subr.bf16.mxu1 %v4965_v45  ;;  %v5299_v45 = vld [vmem:[#allocation46_spill] sm:$0xff] }
 0x596   :  { %2967 = vmatpush1.bf16.msra.mxu0 %v4970_v46  ;;  %3010 = vmatpush1.bf16.msra.mxu1 %v4972_v47 }
 0x597   :  { %2968 = vmatprep.subr.bf16.mxu0 %v4976_v48  ;;  %3011 = vmatprep.subr.bf16.mxu1 %v4978_v49  ;;  %v5300_v49 = vld [vmem:[#allocation43_spill] sm:$0xff] }
 0x59a   :  { %2969 = vmatpush1.bf16.msra.mxu0 %v4982_v50  ;;  %3012 = vmatpush1.bf16.msra.mxu1 %v4984_v51 }
 0x59b   :  { %2970 = vmatprep.subr.bf16.mxu0 %v4988_v53  ;;  %3013 = vmatprep.subr.bf16.mxu1 %v4990_v54  ;;  %v5301_v53 = vld [vmem:[#allocation41_spill] sm:$0xff] }
 0x59e   :  { %2971 = vmatpush1.bf16.msra.mxu0 %v4994_v55  ;;  %3014 = vmatpush1.bf16.msra.mxu1 %v4996_v56  ;;  %v5302_v56 = vld [vmem:[#allocation47_spill] sm:$0xff] }
 0x59f   :  { %2972 = vmatprep.subr.bf16.mxu0 %v5000_v57  ;;  %3015 = vmatprep.subr.bf16.mxu1 %v5002_v58 }
 0x5a2   :  { %2973 = vmatpush1.bf16.msra.mxu0 %v5006_v59  ;;  %3016 = vmatpush1.bf16.msra.mxu1 %v5008_v60  ;;  %v5303_v59 = vld [vmem:[#allocation45_spill] sm:$0xff] }
 0x5a3   :  { %3354 = vmatprep.subr.bf16.mxu1 %v4069_v63 }
 0x645   :  { %v2639_v8 = vpop.f32.mrf.mxu0  ;;  %v2682_v10 = vpop.f32.mrf.mxu1 }
 0x646   :  { %v2691_v18 = vadd.f32 %v2639_v8, %v5296_v9  ;;  %v2693_v54 = vadd.f32 %v2682_v10, %v5301_v53  ;;  %v4064_v8 = vld [vmem:[#allocation10 + $0xe0] ss:$16 sps:$4 sm:$0xff]   ;;  %v4067_v9 = vld [vmem:[#allocation10 + $0xe8] ss:$16 sps:$4 sm:$0xff]   ;;  %v4075_v10 = vld [vmem:[#allocation10 + $0xcc] ss:$16 sps:$4 sm:$0xff]  }
 0x647   :  { %v2641_v16 = vpop.f32.mrf.mxu0  ;;  %v2684_v39 = vpop.f32.mrf.mxu1  ;;  %v4105_v53 = vld [vmem:[#allocation10 + $0x2c] ss:$16 sps:$4 sm:$0xff]  }
 0x648   :  { %v3758_v23 = vmul.f32 -1.442695, %v2691_v18  ;;  %v2692_v36 = vadd.f32 %v2641_v16, %v5297_v22  ;;  %v2694_v50 = vadd.f32 %v2684_v39, %v5300_v49  ;;  %v4072_v18 = vld [vmem:[#allocation10 + $0xc4] ss:$16 sps:$4 sm:$0xff]   ;;  %v4070_v16 = vld [vmem:[#allocation10 + $0xc0] ss:$16 sps:$4 sm:$0xff]  }
 0x649   :  { %v2643_v37 = vpop.f32.mrf.mxu0  ;;  %v2686_v47 = vpop.f32.mrf.mxu1  ;;  %v4078_v22 = vld [vmem:[#allocation10 + $0xa4] ss:$16 sps:$4 sm:$0xff]   ;;  %v4094_v49 = vld [vmem:[#allocation10 + $0x40] ss:$16 sps:$4 sm:$0xff]  }
 0x64a   :  { %4272 = vpow2.f32 %v3758_v23  ;;  %v3760_v38 = vmul.f32 -1.442695, %v2692_v36  ;;  %v2695_v41 = vadd.f32 %v2643_v37, %v5298_v40  ;;  %v3762_v55 = vmul.f32 -1.442695, %v2694_v50  ;;  %v4073_v23 = vld [vmem:[#allocation10 + $0xc8] ss:$16 sps:$4 sm:$0xff]  }
 0x64b   :  { %v2645_v42 = vpop.f32.mrf.mxu0  ;;  %v2688_v51 = vpop.f32.mrf.mxu1  ;;  %v2697_v60 = vadd.f32 %v2686_v47, %v5303_v59  ;;  %v4081_v36 = vld [vmem:[#allocation10 + $0xac] ss:$16 sps:$4 sm:$0xff]   ;;  %v4076_v37 = vld [vmem:[#allocation10 + $0xa0] ss:$16 sps:$4 sm:$0xff]   ;;  %v4084_v39 = vld [vmem:[#allocation10 + $0x84] ss:$16 sps:$4 sm:$0xff]  }
 0x64c   :  { %4274 = vpow2.f32 %v3760_v38  ;;  %v3759_v44 = vmul.f32 -1.442695, %v2695_v41  ;;  %v2696_v46 = vadd.f32 %v2645_v42, %v5299_v45  ;;  %v2698_v57 = vadd.f32 %v2688_v51, %v5302_v56  ;;  %v4082_v38 = vld [vmem:[#allocation10 + $0x80] ss:$16 sps:$4 sm:$0xff]   ;;  %v4085_v40 = vld [vmem:[#allocation10 + $0x88] ss:$16 sps:$4 sm:$0xff]  }
 0x64d   :  { %v4087_v41 = vld [vmem:[#allocation10 + $0x8c] ss:$16 sps:$4 sm:$0xff]   ;;  %v4090_v42 = vld [vmem:[#allocation10 + $0x64] ss:$16 sps:$4 sm:$0xff]   ;;  %v4088_v45 = vld [vmem:[#allocation10 + $0x60] ss:$16 sps:$4 sm:$0xff]  }
 0x64e   :  { %4276 = vpow2.f32 %v3759_v44  ;;  %v3761_v48 = vmul.f32 -1.442695, %v2696_v46  ;;  %v3763_v1 = vmul.f32 -1.442695, %v2698_v57  ;;  %v4093_v44 = vld [vmem:[#allocation10 + $0x6c] ss:$16 sps:$4 sm:$0xff]  }
 0x64f   :  { %v4091_v46 = vld [vmem:[#allocation10 + $0x68] ss:$16 sps:$4 sm:$0xff]   ;;  %v4096_v47 = vld [vmem:[#allocation10 + $0x44] ss:$16 sps:$4 sm:$0xff]   ;;  %v4111_v57 = vld [vmem:[#allocation10 + $0xc] ss:$16 sps:$4 sm:$0xff]  }
 0x650   :  { %4278 = vpow2.f32 %v3761_v48  ;;  %v4099_v48 = vld [vmem:[#allocation10 + $0x4c] ss:$16 sps:$4 sm:$0xff]   ;;  %v4097_v50 = vld [vmem:[#allocation10 + $0x48] ss:$16 sps:$4 sm:$0xff]   ;;  %v4102_v51 = vld [vmem:[#allocation10 + $0x24] ss:$16 sps:$4 sm:$0xff]  }
 0x651   :  { %4280 = vtanh.f32 %v2693_v54  ;;  %v4100_v54 = vld [vmem:[#allocation10 + $0x20] ss:$16 sps:$4 sm:$0xff]   ;;  %v4108_v56 = vld [vmem:[#allocation10 + $0x4] ss:$16 sps:$4 sm:$0xff]   ;;  %v4109_v59 = vld [vmem:[#allocation10 + $0x8] ss:$16 sps:$4 sm:$0xff]  }
 0x652   :  { %4282 = vpow2.f32 %v3762_v55  ;;  %v4103_v55 = vld [vmem:[#allocation10 + $0x28] ss:$16 sps:$4 sm:$0xff]  }
 0x657   :  { %v4273_v58 = vpop.eup %4272 }
 0x658   :  { %v2705_v27 = vadd.f32 1.0, %v4273_v58  ;;  %v4106_v58 = vld [vmem:[#allocation10] ss:$16 sps:$4 sm:$0xff]  }
 0x659   :  { %v4275_v61 = vpop.eup %4274 }
 0x65a   :  { %4284 = vrcp.f32 %v2705_v27  ;;  %v2717_v0 = vadd.f32 1.0, %v4275_v61  ;;  %v5304_v27 = vld [vmem:[#allocation48_spill] sm:$0xff] }
 0x65b   :  { %v4277_v3 = vpop.eup %4276  ;;  %4286 = vtanh.f32 %v2697_v60 }
 0x65c   :  { %4288 = vrcp.f32 %v2717_v0  ;;  %v2706_v5 = vadd.f32 1.0, %v4277_v3 }
 0x65d   :  { %v4279_v33 = vpop.eup %4278  ;;  %4290 = vpow2.f32 %v3763_v1 }
 0x65e   :  { %4292 = vrcp.f32 %v2706_v5  ;;  %v2718_v2 = vadd.f32 1.0, %v4279_v33  ;;  %v4281_v43 = vpop.eup %4280  ;;  %v5305_v5 = vld [vmem:[#allocation50_spill] sm:$0xff] }
 0x65f   :  { %v4283_v32 = vpop.eup %4282 }
 0x660   :  { %4294 = vrcp.f32 %v2718_v2  ;;  %v2731_v31 = vadd.f32 1.0, %v4283_v32 }
 0x662   :  { %4296 = vrcp.f32 %v2731_v31 }
 0x667   :  { %v4285_v4 = vpop.eup %4284 }
 0x668   :  { %v4287_v52 = vpop.eup %4286  ;;  %v2739_v7 = vmul.f32 %v4285_v4, %v4281_v43  ;;  %v5306_v4 = vld [vmem:[#allocation52_spill] sm:$0xff] }
 0x669   :  { %v4289_v11 = vpop.eup %4288 }
 0x66a   :  { %v4291_v12 = vpop.eup %4290  ;;  %v2737_v13 = vmul.f32 %v4289_v11, %v5125_v34 }
 0x66b   :  { %v4293_v25 = vpop.eup %4292  ;;  %v2732_v6 = vadd.f32 1.0, %v4291_v12  ;;  %v5307_v12 = vld [vmem:[#allocation54_spill] sm:$0xff] }
 0x66c   :  { %v5173_v29 = vadd.f32 %v2739_v7, %v2737_v13  ;;  %v2740_v21 = vmul.f32 %v4293_v25, %v4287_v52 }
 0x66d   :  { %v4295_v28 = vpop.eup %4294 }
 0x66e   :  { %v2738_v17 = vmul.f32 %v4295_v28, %v5128_v26  ;;  %4298 = vtanh.f32 %v5173_v29  ;;  %v4066_v26 = vld [vmem:[#allocation10 + $0xe4] ss:$16 sps:$4 sm:$0xff]  }
 0x66f   :  { %4300 = vrcp.f32 %v2732_v6  ;;  %v4297_v24 = vpop.eup %4296  ;;  %3311 = vmatprep.subr.bf16.mxu0 %v4066_v26 }
 0x670   :  { %v5176_v20 = vadd.f32 %v2740_v21, %v2738_v17  ;;  %v5308_v21 = vld [vmem:[#allocation51_spill] sm:$0xff]  ;;  %v5309_v17 = vld [vmem:[#allocation49_spill] sm:$0xff] }
 0x672   :  { %4302 = vtanh.f32 %v5176_v20 }
 0x67b   :  { %v4299_v30 = vpop.eup %4298 }
 0x67c   :  { %v4301_v34 = vpop.eup %4300  ;;  %v2745_v19 = vmul.f32 %v4299_v30, %v4297_v24 }
 0x67f   :  { %v4303_v15 = vpop.eup %4302 }
 0x680   :  { %v2746_v35 = vmul.f32 %v4303_v15, %v4301_v34  ;;  %v5310_v34 = vld [vmem:[#allocation55_spill] sm:$0xff] }
 0x682   :  { %v2747_v62 = vpack.c.bf16 %v2746_v35, %v2745_v19  ;;  %v5311_v35 = vld [vmem:[#allocation53_spill] sm:$0xff] }
 0x684   :  { %3891 = vst [vmem:[#allocation11 + $0x28] sm:$0xff] %v2747_v62   ;;  %2991 = vmatmul.mubr.bf16.vlgmr.msra.gmra.mxu0 %v2747_v62  ;;  %3034 = vmatmul.mubr.bf16.vlgmr.msra.gmra.mxu1 %v2747_v62 }
 0x685   :  { %3343 = vmatprep.mubr.bf16.mxu0 %v5270_v14  ;;  %3386 = vmatprep.mubr.bf16.mxu1 %v5270_v14  ;;  %v4079_v14 = vld [vmem:[#allocation10 + $0xa8] ss:$16 sps:$4 sm:$0xff]  }
 0x686   :  { %3312 = vmatpush1.bf16.msra.mxu0 %v4064_v8  ;;  %3355 = vmatpush1.bf16.msra.mxu1 %v4067_v9 }
 0x687   :  { %3313 = vmatprep.subr.bf16.mxu0 %v4072_v18  ;;  %3356 = vmatprep.subr.bf16.mxu1 %v4075_v10 }
 0x68a   :  { %3314 = vmatpush1.bf16.msra.mxu0 %v4070_v16  ;;  %3357 = vmatpush1.bf16.msra.mxu1 %v4073_v23 }
 0x68b   :  { %3315 = vmatprep.subr.bf16.mxu0 %v4078_v22  ;;  %3358 = vmatprep.subr.bf16.mxu1 %v4081_v36 }
 0x68e   :  { %3316 = vmatpush1.bf16.msra.mxu0 %v4076_v37  ;;  %3359 = vmatpush1.bf16.msra.mxu1 %v4079_v14 }
 0x68f   :  { %3317 = vmatprep.subr.bf16.mxu0 %v4084_v39  ;;  %3360 = vmatprep.subr.bf16.mxu1 %v4087_v41 }
 0x692   :  { %3318 = vmatpush1.bf16.msra.mxu0 %v4082_v38  ;;  %3361 = vmatpush1.bf16.msra.mxu1 %v4085_v40 }
 0x693   :  { %3319 = vmatprep.subr.bf16.mxu0 %v4090_v42  ;;  %3362 = vmatprep.subr.bf16.mxu1 %v4093_v44 }
 0x696   :  { %3320 = vmatpush1.bf16.msra.mxu0 %v4088_v45  ;;  %3363 = vmatpush1.bf16.msra.mxu1 %v4091_v46 }
 0x697   :  { %3321 = vmatprep.subr.bf16.mxu0 %v4096_v47  ;;  %3364 = vmatprep.subr.bf16.mxu1 %v4099_v48 }
 0x69a   :  { %3322 = vmatpush1.bf16.msra.mxu0 %v4094_v49  ;;  %3365 = vmatpush1.bf16.msra.mxu1 %v4097_v50 }
 0x69b   :  { %3323 = vmatprep.subr.bf16.mxu0 %v4102_v51  ;;  %3366 = vmatprep.subr.bf16.mxu1 %v4105_v53 }
 0x69e   :  { %3324 = vmatpush1.bf16.msra.mxu0 %v4100_v54  ;;  %3367 = vmatpush1.bf16.msra.mxu1 %v4103_v55 }
 0x69f   :  { %3325 = vmatprep.subr.bf16.mxu0 %v4108_v56  ;;  %3368 = vmatprep.subr.bf16.mxu1 %v4111_v57 }
 0x6a2   :  { %3326 = vmatpush1.bf16.msra.mxu0 %v4106_v58  ;;  %3369 = vmatpush1.bf16.msra.mxu1 %v4109_v59 }
 0x744   :  { %v2992_v60 = vpop.f32.mrf.mxu0  ;;  %v3035_v1 = vpop.f32.mrf.mxu1 }
 0x745   :  { %v3044_v61 = vadd.f32 %v2992_v60, %v5304_v27  ;;  %v3046_v24 = vadd.f32 %v3035_v1, %v5309_v17  ;;  %v5313_v1 = vld [vmem:[#allocation58_spill] sm:$0xff]  ;;  %v5318_v17 = vld [vmem:[#allocation63_spill] sm:$0xff] }
 0x746   :  { %v2994_v0 = vpop.f32.mrf.mxu0  ;;  %v3037_v32 = vpop.f32.mrf.mxu1 }
 0x747   :  { %v3798_v3 = vmul.f32 -1.442695, %v3044_v61  ;;  %v3045_v33 = vadd.f32 %v2994_v0, %v5305_v5  ;;  %v3047_v28 = vadd.f32 %v3037_v32, %v5308_v21  ;;  %v5317_v21 = vld [vmem:[#allocation57_spill] sm:$0xff] }
 0x748   :  { %v2996_v2 = vpop.f32.mrf.mxu0  ;;  %v3039_v25 = vpop.f32.mrf.mxu1 }
 0x749   :  { %4304 = vpow2.f32 %v3798_v3  ;;  %v3800_v43 = vmul.f32 -1.442695, %v3045_v33  ;;  %v3048_v52 = vadd.f32 %v2996_v2, %v5306_v4  ;;  %v3802_v30 = vmul.f32 -1.442695, %v3047_v28  ;;  %v5314_v2 = vld [vmem:[#allocation60_spill] sm:$0xff] }
 0x74a   :  { %v2998_v7 = vpop.f32.mrf.mxu0  ;;  %v3041_v6 = vpop.f32.mrf.mxu1  ;;  %v3050_v62 = vadd.f32 %v3039_v25, %v5311_v35 }
 0x74b   :  { %4306 = vpow2.f32 %v3800_v43  ;;  %v3799_v11 = vmul.f32 -1.442695, %v3048_v52  ;;  %v3049_v13 = vadd.f32 %v2998_v7, %v5307_v12  ;;  %v3051_v15 = vadd.f32 %v3041_v6, %v5310_v34  ;;  %v5315_v52 = vld [vmem:[#allocation62_spill] sm:$0xff]  ;;  %v5319_v34 = vld [vmem:[#allocation61_spill] sm:$0xff] }
 0x74d   :  { %4308 = vpow2.f32 %v3799_v11  ;;  %v3801_v31 = vmul.f32 -1.442695, %v3049_v13  ;;  %v3803_v8 = vmul.f32 -1.442695, %v3051_v15  ;;  %v5316_v13 = vld [vmem:[#allocation59_spill] sm:$0xff] }
 0x74f   :  { %4310 = vpow2.f32 %v3801_v31 }
 0x750   :  { %4312 = vtanh.f32 %v3046_v24 }
 0x751   :  { %4314 = vpow2.f32 %v3802_v30 }
 0x756   :  { %v4305_v19 = vpop.eup %4304 }
 0x757   :  { %v3058_v26 = vadd.f32 1.0, %v4305_v19 }
 0x758   :  { %v4307_v63 = vpop.eup %4306 }
 0x759   :  { %4316 = vrcp.f32 %v3058_v26  ;;  %v3070_v9 = vadd.f32 1.0, %v4307_v63 }
 0x75a   :  { %v4309_v18 = vpop.eup %4308  ;;  %4318 = vtanh.f32 %v3050_v62 }
 0x75b   :  { %4320 = vrcp.f32 %v3070_v9  ;;  %v3059_v10 = vadd.f32 1.0, %v4309_v18 }
 0x75c   :  { %v4311_v16 = vpop.eup %4310  ;;  %4322 = vpow2.f32 %v3803_v8 }
 0x75d   :  { %4324 = vrcp.f32 %v3059_v10  ;;  %v3071_v23 = vadd.f32 1.0, %v4311_v16  ;;  %v4313_v22 = vpop.eup %4312 }
 0x75e   :  { %v4315_v36 = vpop.eup %4314 }
 0x75f   :  { %4326 = vrcp.f32 %v3071_v23  ;;  %v3084_v44 = vadd.f32 1.0, %v4315_v36 }
 0x761   :  { %4328 = vrcp.f32 %v3084_v44 }
 0x766   :  { %v4317_v37 = vpop.eup %4316 }
 0x767   :  { %v4319_v14 = vpop.eup %4318  ;;  %v3092_v38 = vmul.f32 %v4317_v37, %v4313_v22 }
 0x768   :  { %v4321_v39 = vpop.eup %4320 }
 0x769   :  { %v4323_v40 = vpop.eup %4322  ;;  %v3090_v41 = vmul.f32 %v4321_v39, %v5173_v29 }
 0x76a   :  { %v4325_v42 = vpop.eup %4324  ;;  %v3085_v48 = vadd.f32 1.0, %v4323_v40 }
 0x76b   :  { %v5191_v45 = vadd.f32 %v3092_v38, %v3090_v41  ;;  %v3093_v46 = vmul.f32 %v4325_v42, %v4319_v14 }
 0x76c   :  { %v4327_v47 = vpop.eup %4326 }
 0x76d   :  { %v3091_v49 = vmul.f32 %v4327_v47, %v5176_v20  ;;  %4330 = vtanh.f32 %v5191_v45  ;;  %v5312_v20 = vld [vmem:[#allocation56_spill] sm:$0xff] }
 0x76e   :  { %4332 = vrcp.f32 %v3085_v48  ;;  %v4329_v51 = vpop.eup %4328 }
 0x76f   :  { %v5194_v50 = vadd.f32 %v3093_v46, %v3091_v49 }
 0x771   :  { %4334 = vtanh.f32 %v5194_v50 }
 0x77a   :  { %v4331_v53 = vpop.eup %4330 }
 0x77b   :  { %v4333_v29 = vpop.eup %4332  ;;  %v3098_v55 = vmul.f32 %v4331_v53, %v4329_v51 }
 0x77e   :  { %v4335_v54 = vpop.eup %4334 }
 0x77f   :  { %v3099_v56 = vmul.f32 %v4335_v54, %v4333_v29 }
 0x781   :  { %v3100_v57 = vpack.c.bf16 %v3099_v56, %v3098_v55 }
 0x783   :  { %3896 = vst [vmem:[#allocation11 + $0x30] sm:$0xff] %v3100_v57   ;;  %3344 = vmatmul.mubr.bf16.vlgmr.msra.gmra.mxu0 %v3100_v57  ;;  %3387 = vmatmul.mubr.bf16.vlgmr.msra.gmra.mxu1 %v3100_v57 }
 0x843   :  { %v3345_v58 = vpop.f32.mrf.mxu0  ;;  %v3388_v60 = vpop.f32.mrf.mxu1 }
 0x844   :  { %v3397_v59 = vadd.f32 %v3345_v58, %v5312_v20  ;;  %v3399_v28 = vadd.f32 %v3388_v60, %v5317_v21 }
 0x845   :  { %v3347_v27 = vpop.f32.mrf.mxu0  ;;  %v3390_v33 = vpop.f32.mrf.mxu1 }
 0x846   :  { %v3838_v61 = vmul.f32 -1.442695, %v3397_v59  ;;  %v3398_v0 = vadd.f32 %v3347_v27, %v5313_v1  ;;  %v3400_v25 = vadd.f32 %v3390_v33, %v5316_v13 }
 0x847   :  { %v3349_v3 = vpop.f32.mrf.mxu0  ;;  %v3392_v11 = vpop.f32.mrf.mxu1 }
 0x848   :  { %4336 = vpow2.f32 %v3838_v61  ;;  %v3840_v5 = vmul.f32 -1.442695, %v3398_v0  ;;  %v3401_v43 = vadd.f32 %v3349_v3, %v5314_v2  ;;  %v3842_v6 = vmul.f32 -1.442695, %v3400_v25 }
 0x849   :  { %v3351_v32 = vpop.f32.mrf.mxu0  ;;  %v3394_v31 = vpop.f32.mrf.mxu1  ;;  %v3403_v15 = vadd.f32 %v3392_v11, %v5319_v34 }
 0x84a   :  { %4338 = vpow2.f32 %v3840_v5  ;;  %v3839_v4 = vmul.f32 -1.442695, %v3401_v43  ;;  %v3402_v7 = vadd.f32 %v3351_v32, %v5315_v52  ;;  %v3404_v24 = vadd.f32 %v3394_v31, %v5318_v17 }
 0x84c   :  { %4340 = vpow2.f32 %v3839_v4  ;;  %v3841_v12 = vmul.f32 -1.442695, %v3402_v7  ;;  %v3843_v62 = vmul.f32 -1.442695, %v3404_v24 }
 0x84e   :  { %4342 = vpow2.f32 %v3841_v12 }
 0x84f   :  { %4344 = vtanh.f32 %v3399_v28 }
 0x850   :  { %4346 = vpow2.f32 %v3842_v6 }
 0x855   :  { %v4337_v30 = vpop.eup %4336 }
 0x856   :  { %v3411_v19 = vadd.f32 1.0, %v4337_v30 }
 0x857   :  { %v4339_v35 = vpop.eup %4338 }
 0x858   :  { %4348 = vrcp.f32 %v3411_v19  ;;  %v3423_v26 = vadd.f32 1.0, %v4339_v35 }
 0x859   :  { %v4341_v63 = vpop.eup %4340  ;;  %4350 = vtanh.f32 %v3403_v15 }
 0x85a   :  { %4352 = vrcp.f32 %v3423_v26  ;;  %v3412_v8 = vadd.f32 1.0, %v4341_v63 }
 0x85b   :  { %v4343_v9 = vpop.eup %4342  ;;  %4354 = vpow2.f32 %v3843_v62 }
 0x85c   :  { %4356 = vrcp.f32 %v3412_v8  ;;  %v3424_v18 = vadd.f32 1.0, %v4343_v9  ;;  %v4345_v10 = vpop.eup %4344 }
 0x85d   :  { %v4347_v16 = vpop.eup %4346 }
 0x85e   :  { %4358 = vrcp.f32 %v3424_v18  ;;  %v3437_v14 = vadd.f32 1.0, %v4347_v16 }
 0x860   :  { %4360 = vrcp.f32 %v3437_v14 }
 0x865   :  { %v4349_v23 = vpop.eup %4348 }
 0x866   :  { %v4351_v22 = vpop.eup %4350  ;;  %v3445_v36 = vmul.f32 %v4349_v23, %v4345_v10 }
 0x867   :  { %v4353_v37 = vpop.eup %4352 }
 0x868   :  { %v4355_v38 = vpop.eup %4354  ;;  %v3443_v39 = vmul.f32 %v4353_v37, %v5191_v45 }
 0x869   :  { %v4357_v40 = vpop.eup %4356  ;;  %v3438_v46 = vadd.f32 1.0, %v4355_v38 }
 0x86a   :  { %v3447_v41 = vadd.f32 %v3445_v36, %v3443_v39  ;;  %v3446_v42 = vmul.f32 %v4357_v40, %v4351_v22 }
 0x86b   :  { %v4359_v44 = vpop.eup %4358 }
 0x86c   :  { %4362 = vtanh.f32 %v3447_v41  ;;  %v3444_v47 = vmul.f32 %v4359_v44, %v5194_v50 }
 0x86d   :  { %4364 = vrcp.f32 %v3438_v46  ;;  %v4361_v49 = vpop.eup %4360 }
 0x86e   :  { %v3448_v48 = vadd.f32 %v3446_v42, %v3444_v47 }
 0x870   :  { %4366 = vtanh.f32 %v3448_v48 }
 0x879   :  { %v4363_v51 = vpop.eup %4362 }
 0x87a   :  { %v3451_v53 = vmul.f32 %v4363_v51, %v4361_v49  ;;  %v4365_v29 = vpop.eup %4364 }
 0x87d   :  { %v4367_v54 = vpop.eup %4366 }
 0x87e   :  { %v3452_v45 = vmul.f32 %v4367_v54, %v4365_v29 }
 0x880   :  { %v3900_v55 = vpack.c.bf16 %v3452_v45, %v3451_v53 }
 0x882   :  { %3901 = vst [vmem:[#allocation11 + $0x38] sm:$0xff] %v3900_v55  }
 0x883   :  { %4439 = shalt.err (!%p4436_p5)
}
 0x884   :  { %3479 = dma.vmem_to_hbm [thread:$0]  %s3474_s7, 1024, %s5218_s4, [#allocation7], %s4458_s25, %s4458_s25, %s4459_s26  }
 0x885   :  { %4452 = dma.done.wait [#allocation7], 1024  }
 0x886   :  { %4453 = vsyncadd [#allocation7], 4294966272 }
 0x887   :  { %3483 = vsyncpa [#allocation6], 1 }
 0x888   :  { %3484 = vsyncpa [#allocation9], 1 }
 0x889   :  { %3485 = vsyncpa [#allocation7], 1 }

</bundles_post_ra>
